<compile_context>
chip_gen: v7x
topology: tpu7x:2x2x1
jax: 0.10.0
libtpu: 0.0.40
codegen_flags: <defaults>
</compile_context>

<pallas_src>
import functools

import jax
import jax.numpy as jnp
from jax import lax
from jax.experimental import pallas as pl
from jax.experimental.pallas import tpu as pltpu

_LANES = 128
_SUBLANES = 8

# small fused path
_SMALL_TILE_ROWS = 64                                # 64x128 f32 = 32 KiB / tile
_SMALL_MAX_ELEMS = _SMALL_TILE_ROWS * _LANES * 8     # <= 8 tiles per small tensor

# large streaming path
_STREAM_TILE_ROWS = 2048                             # 1 MiB f32 / tile
_CHUNK_ROWS = 128                                    # unrolled accumulation chunk


def _round_up(x, m):
    return (x + m - 1) // m * m


def _cdiv(a, b):
    return -(-a // b)


# --------------------------------------------------------------------------
# Large-tensor path: one pallas_call per tensor, streaming it in place.
# --------------------------------------------------------------------------
def _stream_kernel(x_ref, o_ref, sum_sc, sq_sc, *,
                   tile_rows, chunk_rows, total_rows, num_tiles, n_elems):
    g = pl.program_id(0)

    @pl.when(g == 0)
    def _():
        sum_sc[...] = jnp.zeros_like(sum_sc)
        sq_sc[...] = jnp.zeros_like(sq_sc)

    nchunks = tile_rows // chunk_rows

    def accumulate(valid_rows):
        # valid_rows is a Python int; mask only compiled when actually needed.
        def body(c, carry):
            s, q = carry
            x = x_ref[pl.ds(c * chunk_rows, chunk_rows), :].astype(jnp.float32)
            if valid_rows < tile_rows:
                row = c * chunk_rows + lax.broadcasted_iota(
                    jnp.int32, (chunk_rows, _LANES), 0)
                # where (not multiply) so boundary-tile garbage (NaN/Inf) is excluded
                x = jnp.where(row < valid_rows, x, 0.0)
            xr = x.reshape(chunk_rows // _SUBLANES, _SUBLANES, _LANES)
            return (s + jnp.sum(xr, axis=0), q + jnp.sum(xr * xr, axis=0))

        s, q = lax.fori_loop(0, nchunks, body,
                             (sum_sc[...], sq_sc[...]), unroll=True)
        sum_sc[...] = s
        sq_sc[...] = q

    last_valid = total_rows - (num_tiles - 1) * tile_rows
    if last_valid == tile_rows:                      # every tile is full
        accumulate(tile_rows)
    else:
        @pl.when(g < num_tiles - 1)
        def _():
            accumulate(tile_rows)

        @pl.when(g == num_tiles - 1)
        def _():
            accumulate(last_valid)

    @pl.when(g == num_tiles - 1)
    def _():
        n = float(n_elems)
        s = jnp.sum(sum_sc[...])                     # one cross-lane reduce / tensor
        ss = jnp.sum(sq_sc[...])
        mean = s / n
        var = (ss - n * mean * mean) / (n - 1.0)     # unbiased, like torch.std
        var = jnp.maximum(var, 0.0)
        o_ref[...] = jnp.full((_SUBLANES, _LANES), mean + jnp.sqrt(var),
                              dtype=jnp.float32)


def _run_stream_call(slab, kernel, tile_rows, num_tiles, use_buffered):
    if use_buffered:
        in_spec = pl.BlockSpec((tile_rows, _LANES), lambda g: (g, 0),
                               pipeline_mode=pl.Buffered(3))
    else:
        in_spec = pl.BlockSpec((tile_rows, _LANES), lambda g: (g, 0))
    return pl.pallas_call(
        kernel,
        out_shape=jax.ShapeDtypeStruct((_SUBLANES, _LANES), jnp.float32),
        grid_spec=pltpu.PrefetchScalarGridSpec(
            num_scalar_prefetch=0,
            grid=(num_tiles,),
            in_specs=[in_spec],
            out_specs=pl.BlockSpec((_SUBLANES, _LANES), lambda g: (0, 0)),
            scratch_shapes=[pltpu.VMEM((_SUBLANES, _LANES), jnp.float32),
                            pltpu.VMEM((_SUBLANES, _LANES), jnp.float32)],
        ),
        compiler_params=pltpu.CompilerParams(
            dimension_semantics=("arbitrary",)),
    )(slab)


def _stream_mean_std(x):
    """mean + unbiased std of one large tensor, streamed in place."""
    n = int(x.size)
    flat = x.reshape(-1)                             # free bitcast of contiguous data
    rem = n % _LANES
    if rem:
        flat = jnp.pad(flat, (0, _LANES - rem))      # one pad copy (tail only case)
    rows = int(flat.size) // _LANES
    slab = flat.reshape(rows, _LANES)                # free: contiguous -> lane-major

    tile_rows = min(_STREAM_TILE_ROWS, (rows // _CHUNK_ROWS) * _CHUNK_ROWS)
    num_tiles = _cdiv(rows, tile_rows)

    kernel = functools.partial(
        _stream_kernel, tile_rows=tile_rows, chunk_rows=_CHUNK_ROWS,
        total_rows=rows, num_tiles=num_tiles, n_elems=n)

    try:
        out = _run_stream_call(slab, kernel, tile_rows, num_tiles, True)
    except Exception:
        # pl.Buffered / deeper pipelining unavailable -> default double buffer
        out = _run_stream_call(slab, kernel, tile_rows, num_tiles, False)
    return out[0, 0]


# --------------------------------------------------------------------------
# Small-tensor path: all small tensors of one dtype fused in one pallas_call,
# 1-D grid over the real tiles (scalar-prefetched tile->tensor maps).
# --------------------------------------------------------------------------
def _small_kernel(tt_ref, tf_ref, tl_ref, ne_ref, x_ref, o_ref, sum_sc, sq_sc):
    g = pl.program_id(0)

    @pl.when(tf_ref[g] == 1)                         # first tile of this tensor
    def _():
        sum_sc[...] = jnp.zeros_like(sum_sc)
        sq_sc[...] = jnp.zeros_like(sq_sc)

    x = x_ref[...].astype(jnp.float32)               # (64, 128) -> 8 vregs
    xr = x.reshape(_SMALL_TILE_ROWS // _SUBLANES, _SUBLANES, _LANES)
    sum_sc[...] += jnp.sum(xr, axis=0)               # zero padding contributes 0
    sq_sc[...] += jnp.sum(xr * xr, axis=0)

    @pl.when(tl_ref[g] == 1)                         # last tile -> finalize
    def _():
        n = ne_ref[tt_ref[g]].astype(jnp.float32)
        s = jnp.sum(sum_sc[...])
        ss = jnp.sum(sq_sc[...])
        mean = s / n
        var = (ss - n * mean * mean) / (n - 1.0)
        var = jnp.maximum(var, 0.0)
        o_ref[...] = jnp.full((_SUBLANES, _LANES), mean + jnp.sqrt(var),
                              dtype=jnp.float32)


def _fused_small_mean_std(tensors):
    """mean + unbiased std for a list of same-dtype small tensors, one launch."""
    T = len(tensors)
    slabs, tile_tensor, tile_first, tile_last, nelems = [], [], [], [], []
    for t_idx, x in enumerate(tensors):
        size = int(x.size)
        rows = max(1, _cdiv(size, _LANES))
        padded_rows = _round_up(rows, _SMALL_TILE_ROWS)
        flat = x.reshape(-1)
        pad = padded_rows * _LANES - size
        if pad:
            flat = jnp.pad(flat, (0, pad))           # zeros: exact for sum / sum-sq
        slabs.append(flat.reshape(padded_rows, _LANES))
        ntiles = padded_rows // _SMALL_TILE_ROWS
        tile_tensor += [t_idx] * ntiles
        tile_first += [1] + [0] * (ntiles - 1)
        tile_last += [0] * (ntiles - 1) + [1]
        nelems.append(size)

    slab = slabs[0] if T == 1 else jnp.concatenate(slabs, axis=0)
    G = len(tile_tensor)

    out = pl.pallas_call(
        _small_kernel,
        out_shape=jax.ShapeDtypeStruct((_SUBLANES * T, _LANES), jnp.float32),
        grid_spec=pltpu.PrefetchScalarGridSpec(
            num_scalar_prefetch=4,
            grid=(G,),
            in_specs=[pl.BlockSpec((_SMALL_TILE_ROWS, _LANES),
                                   lambda g, tt, tf, tl, ne: (g, 0))],
            out_specs=pl.BlockSpec((_SUBLANES, _LANES),
                                   lambda g, tt, tf, tl, ne: (tt[g], 0)),
            scratch_shapes=[pltpu.VMEM((_SUBLANES, _LANES), jnp.float32),
                            pltpu.VMEM((_SUBLANES, _LANES), jnp.float32)],
        ),
        compiler_params=pltpu.CompilerParams(
            dimension_semantics=("arbitrary",)),
    )(jnp.asarray(tile_tensor, jnp.int32),
      jnp.asarray(tile_first, jnp.int32),
      jnp.asarray(tile_last, jnp.int32),
      jnp.asarray(nelems, jnp.int32),
      slab)

    vals = out.reshape(T, _SUBLANES, _LANES)[:, 0, 0]   # one strided gather
    return [vals[j] for j in range(T)]


# --------------------------------------------------------------------------
# Module forward
# --------------------------------------------------------------------------
def _cast_back(v, dtype):
    return v.astype(dtype) if jnp.issubdtype(dtype, jnp.floating) else v


def pt_module_forward(inputs):
    """Forward pass of PtModule: list of tensors -> list of scalar results."""
    inputs = [jnp.asarray(x) for x in inputs]
    results = [None] * len(inputs)

    small_groups = {}
    for i, x in enumerate(inputs):
        if int(x.size) > _SMALL_MAX_ELEMS:
            results[i] = _cast_back(_stream_mean_std(x), x.dtype)
        else:
            small_groups.setdefault(jnp.dtype(x.dtype), []).append(i)

    for _, idxs in small_groups.items():             # one fused launch per dtype
        vals = _fused_small_mean_std([inputs[i] for i in idxs])
        for i, v in zip(idxs, vals):
            results[i] = _cast_back(v, inputs[i].dtype)
    return results


if __name__ == "__main__":
    key = jax.random.PRNGKey(0)
    ks = jax.random.split(key, 6)

    # Deterministic example inputs: several small (fused) tensors including a
    # ragged 105-element one, plus two large tensors to exercise the direct
    # streaming path (one 128-aligned, one ragged -> masked boundary tile).
    inputs = [
        jax.random.normal(ks[0], (2, 4, 16, 16), dtype=jnp.float32),          # 2048
        jax.random.uniform(ks[1], (8, 8, 32), dtype=jnp.float32),             # 2048
        jax.random.normal(ks[2], (3, 5, 7), dtype=jnp.float32) + 2.0,         # 105
        jax.random.normal(ks[3], (4, 256), dtype=jnp.float32) * 3.0,          # 1024
        jax.random.normal(ks[4], (256, 1024), dtype=jnp.float32) * 0.5 + 1.0, # 262144 (aligned)
        jax.random.normal(ks[5], (300, 700), dtype=jnp.float32) * 1.5 - 0.25, # 210000 (ragged)
    ]

    results = pt_module_forward(inputs)
    results = [jax.block_until_ready(r) for r in results]

    # sanity check against plain-JAX reference (unbiased std, like torch.std)
    for t, r in zip(inputs, results):
        t32 = t.astype(jnp.float32)
        ref = jnp.mean(t32) + jnp.std(t32, ddof=1)
        assert jnp.allclose(jnp.float32(r), ref, rtol=1e-3, atol=1e-3), (r, ref)

    print("KERNEL_OK")
</pallas_src>

<mosaic_0001>
module attributes {stable_mosaic.version = 11 : i64} {
  func.func @_stream_kernel(%arg0: i32, %arg1: memref<2048x128xf32, #tpu.memory_space<vmem>>, %arg2: memref<8x128xf32, #tpu.memory_space<vmem>>, %arg3: memref<8x128xf32, #tpu.memory_space<vmem>>, %arg4: memref<8x128xf32, #tpu.memory_space<vmem>>) attributes {dimension_semantics = [#tpu.dimension_semantics<arbitrary>], iteration_bounds = array<i64: 1>, scalar_prefetch = 0 : i64, scratch_operands = 2 : i64, tpu.core_type = #tpu.core_type<tc>, window_params = [{transform_indices = @transform_0, window_bounds = array<i64: 2048, 128>}, {pipeline_mode = #tpu.pipeline_mode<synchronous>, transform_indices = @transform_1, window_bounds = array<i64: 8, 128>}]} {
    %c0_i32 = arith.constant 0 : i32
    %0 = arith.cmpi eq, %arg0, %c0_i32 : i32
    %1 = arith.extui %0 : i1 to i32
    %c0_i32_0 = arith.constant 0 : i32
    %2 = arith.cmpi ne, %1, %c0_i32_0 : i32
    scf.if %2 {
      %cst_73 = arith.constant 0.000000e+00 : f32
      %154 = vector.broadcast %cst_73 : f32 to vector<8x128xf32>
      %c0_74 = arith.constant 0 : index
      %c0_75 = arith.constant 0 : index
      %155 = vector.load %arg3[%c0_74, %c0_75] : memref<8x128xf32, #tpu.memory_space<vmem>>, vector<8x128xf32>
      tpu.vector_store %arg3[%c0_74, %c0_75], %154 {strides = array<i32>} : memref<8x128xf32, #tpu.memory_space<vmem>>, vector<8x128xf32>,
      %cst_76 = arith.constant 0.000000e+00 : f32
      %156 = vector.broadcast %cst_76 : f32 to vector<8x128xf32>
      %c0_77 = arith.constant 0 : index
      %c0_78 = arith.constant 0 : index
      %157 = vector.load %arg4[%c0_77, %c0_78] : memref<8x128xf32, #tpu.memory_space<vmem>>, vector<8x128xf32>
      tpu.vector_store %arg4[%c0_77, %c0_78], %156 {strides = array<i32>} : memref<8x128xf32, #tpu.memory_space<vmem>>, vector<8x128xf32>,
    } else {
    }
    %c0 = arith.constant 0 : index
    %c0_1 = arith.constant 0 : index
    %3 = vector.load %arg3[%c0, %c0_1] : memref<8x128xf32, #tpu.memory_space<vmem>>, vector<8x128xf32>
    %c0_2 = arith.constant 0 : index
    %c0_3 = arith.constant 0 : index
    %4 = vector.load %arg4[%c0_2, %c0_3] : memref<8x128xf32, #tpu.memory_space<vmem>>, vector<8x128xf32>
    %c0_i32_4 = arith.constant 0 : i32
    %c128_i32 = arith.constant 128 : i32
    %5 = arith.muli %c0_i32_4, %c128_i32 : i32
    %6 = arith.index_cast %5 : i32 to index
    %c0_5 = arith.constant 0 : index
    %7 = vector.load %arg1[%6, %c0_5] : memref<2048x128xf32, #tpu.memory_space<vmem>>, vector<128x128xf32>
    %8 = vector.shape_cast %7 : vector<128x128xf32> to vector<16x8x128xf32>
    %cst = arith.constant dense<0.000000e+00> : vector<8x128xf32>
    %9 = vector.multi_reduction <add>, %8, %cst [0] : vector<16x8x128xf32> to vector<8x128xf32>
    %10 = arith.addf %3, %9 : vector<8x128xf32>
    %11 = arith.mulf %8, %8 : vector<16x8x128xf32>
    %cst_6 = arith.constant dense<0.000000e+00> : vector<8x128xf32>
    %12 = vector.multi_reduction <add>, %11, %cst_6 [0] : vector<16x8x128xf32> to vector<8x128xf32>
    %13 = arith.addf %4, %12 : vector<8x128xf32>
    %c1_i32 = arith.constant 1 : i32
    %c128_i32_7 = arith.constant 128 : i32
    %14 = arith.muli %c1_i32, %c128_i32_7 : i32
    %15 = arith.index_cast %14 : i32 to index
    %c0_8 = arith.constant 0 : index
    %16 = vector.load %arg1[%15, %c0_8] : memref<2048x128xf32, #tpu.memory_space<vmem>>, vector<128x128xf32>
    %17 = vector.shape_cast %16 : vector<128x128xf32> to vector<16x8x128xf32>
    %cst_9 = arith.constant dense<0.000000e+00> : vector<8x128xf32>
    %18 = vector.multi_reduction <add>, %17, %cst_9 [0] : vector<16x8x128xf32> to vector<8x128xf32>
    %19 = arith.addf %10, %18 : vector<8x128xf32>
    %20 = arith.mulf %17, %17 : vector<16x8x128xf32>
    %cst_10 = arith.constant dense<0.000000e+00> : vector<8x128xf32>
    %21 = vector.multi_reduction <add>, %20, %cst_10 [0] : vector<16x8x128xf32> to vector<8x128xf32>
    %22 = arith.addf %13, %21 : vector<8x128xf32>
    %c2_i32 = arith.constant 2 : i32
    %c128_i32_11 = arith.constant 128 : i32
    %23 = arith.muli %c2_i32, %c128_i32_11 : i32
    %24 = arith.index_cast %23 : i32 to index
    %c0_12 = arith.constant 0 : index
    %25 = vector.load %arg1[%24, %c0_12] : memref<2048x128xf32, #tpu.memory_space<vmem>>, vector<128x128xf32>
    %26 = vector.shape_cast %25 : vector<128x128xf32> to vector<16x8x128xf32>
    %cst_13 = arith.constant dense<0.000000e+00> : vector<8x128xf32>
    %27 = vector.multi_reduction <add>, %26, %cst_13 [0] : vector<16x8x128xf32> to vector<8x128xf32>
    %28 = arith.addf %19, %27 : vector<8x128xf32>
    %29 = arith.mulf %26, %26 : vector<16x8x128xf32>
    %cst_14 = arith.constant dense<0.000000e+00> : vector<8x128xf32>
    %30 = vector.multi_reduction <add>, %29, %cst_14 [0] : vector<16x8x128xf32> to vector<8x128xf32>
    %31 = arith.addf %22, %30 : vector<8x128xf32>
    %c3_i32 = arith.constant 3 : i32
    %c128_i32_15 = arith.constant 128 : i32
    %32 = arith.muli %c3_i32, %c128_i32_15 : i32
    %33 = arith.index_cast %32 : i32 to index
    %c0_16 = arith.constant 0 : index
    %34 = vector.load %arg1[%33, %c0_16] : memref<2048x128xf32, #tpu.memory_space<vmem>>, vector<128x128xf32>
    %35 = vector.shape_cast %34 : vector<128x128xf32> to vector<16x8x128xf32>
    %cst_17 = arith.constant dense<0.000000e+00> : vector<8x128xf32>
    %36 = vector.multi_reduction <add>, %35, %cst_17 [0] : vector<16x8x128xf32> to vector<8x128xf32>
    %37 = arith.addf %28, %36 : vector<8x128xf32>
    %38 = arith.mulf %35, %35 : vector<16x8x128xf32>
    %cst_18 = arith.constant dense<0.000000e+00> : vector<8x128xf32>
    %39 = vector.multi_reduction <add>, %38, %cst_18 [0] : vector<16x8x128xf32> to vector<8x128xf32>
    %40 = arith.addf %31, %39 : vector<8x128xf32>
    %c4_i32 = arith.constant 4 : i32
    %c128_i32_19 = arith.constant 128 : i32
    %41 = arith.muli %c4_i32, %c128_i32_19 : i32
    %42 = arith.index_cast %41 : i32 to index
    %c0_20 = arith.constant 0 : index
    %43 = vector.load %arg1[%42, %c0_20] : memref<2048x128xf32, #tpu.memory_space<vmem>>, vector<128x128xf32>
    %44 = vector.shape_cast %43 : vector<128x128xf32> to vector<16x8x128xf32>
    %cst_21 = arith.constant dense<0.000000e+00> : vector<8x128xf32>
    %45 = vector.multi_reduction <add>, %44, %cst_21 [0] : vector<16x8x128xf32> to vector<8x128xf32>
    %46 = arith.addf %37, %45 : vector<8x128xf32>
    %47 = arith.mulf %44, %44 : vector<16x8x128xf32>
    %cst_22 = arith.constant dense<0.000000e+00> : vector<8x128xf32>
    %48 = vector.multi_reduction <add>, %47, %cst_22 [0] : vector<16x8x128xf32> to vector<8x128xf32>
    %49 = arith.addf %40, %48 : vector<8x128xf32>
    %c5_i32 = arith.constant 5 : i32
    %c128_i32_23 = arith.constant 128 : i32
    %50 = arith.muli %c5_i32, %c128_i32_23 : i32
    %51 = arith.index_cast %50 : i32 to index
    %c0_24 = arith.constant 0 : index
    %52 = vector.load %arg1[%51, %c0_24] : memref<2048x128xf32, #tpu.memory_space<vmem>>, vector<128x128xf32>
    %53 = vector.shape_cast %52 : vector<128x128xf32> to vector<16x8x128xf32>
    %cst_25 = arith.constant dense<0.000000e+00> : vector<8x128xf32>
    %54 = vector.multi_reduction <add>, %53, %cst_25 [0] : vector<16x8x128xf32> to vector<8x128xf32>
    %55 = arith.addf %46, %54 : vector<8x128xf32>
    %56 = arith.mulf %53, %53 : vector<16x8x128xf32>
    %cst_26 = arith.constant dense<0.000000e+00> : vector<8x128xf32>
    %57 = vector.multi_reduction <add>, %56, %cst_26 [0] : vector<16x8x128xf32> to vector<8x128xf32>
    %58 = arith.addf %49, %57 : vector<8x128xf32>
    %c6_i32 = arith.constant 6 : i32
    %c128_i32_27 = arith.constant 128 : i32
    %59 = arith.muli %c6_i32, %c128_i32_27 : i32
    %60 = arith.index_cast %59 : i32 to index
    %c0_28 = arith.constant 0 : index
    %61 = vector.load %arg1[%60, %c0_28] : memref<2048x128xf32, #tpu.memory_space<vmem>>, vector<128x128xf32>
    %62 = vector.shape_cast %61 : vector<128x128xf32> to vector<16x8x128xf32>
    %cst_29 = arith.constant dense<0.000000e+00> : vector<8x128xf32>
    %63 = vector.multi_reduction <add>, %62, %cst_29 [0] : vector<16x8x128xf32> to vector<8x128xf32>
    %64 = arith.addf %55, %63 : vector<8x128xf32>
    %65 = arith.mulf %62, %62 : vector<16x8x128xf32>
    %cst_30 = arith.constant dense<0.000000e+00> : vector<8x128xf32>
    %66 = vector.multi_reduction <add>, %65, %cst_30 [0] : vector<16x8x128xf32> to vector<8x128xf32>
    %67 = arith.addf %58, %66 : vector<8x128xf32>
    %c7_i32 = arith.constant 7 : i32
    %c128_i32_31 = arith.constant 128 : i32
    %68 = arith.muli %c7_i32, %c128_i32_31 : i32
    %69 = arith.index_cast %68 : i32 to index
    %c0_32 = arith.constant 0 : index
    %70 = vector.load %arg1[%69, %c0_32] : memref<2048x128xf32, #tpu.memory_space<vmem>>, vector<128x128xf32>
    %71 = vector.shape_cast %70 : vector<128x128xf32> to vector<16x8x128xf32>
    %cst_33 = arith.constant dense<0.000000e+00> : vector<8x128xf32>
    %72 = vector.multi_reduction <add>, %71, %cst_33 [0] : vector<16x8x128xf32> to vector<8x128xf32>
    %73 = arith.addf %64, %72 : vector<8x128xf32>
    %74 = arith.mulf %71, %71 : vector<16x8x128xf32>
    %cst_34 = arith.constant dense<0.000000e+00> : vector<8x128xf32>
    %75 = vector.multi_reduction <add>, %74, %cst_34 [0] : vector<16x8x128xf32> to vector<8x128xf32>
    %76 = arith.addf %67, %75 : vector<8x128xf32>
    %c8_i32 = arith.constant 8 : i32
    %c128_i32_35 = arith.constant 128 : i32
    %77 = arith.muli %c8_i32, %c128_i32_35 : i32
    %78 = arith.index_cast %77 : i32 to index
    %c0_36 = arith.constant 0 : index
    %79 = vector.load %arg1[%78, %c0_36] : memref<2048x128xf32, #tpu.memory_space<vmem>>, vector<128x128xf32>
    %80 = vector.shape_cast %79 : vector<128x128xf32> to vector<16x8x128xf32>
    %cst_37 = arith.constant dense<0.000000e+00> : vector<8x128xf32>
    %81 = vector.multi_reduction <add>, %80, %cst_37 [0] : vector<16x8x128xf32> to vector<8x128xf32>
    %82 = arith.addf %73, %81 : vector<8x128xf32>
    %83 = arith.mulf %80, %80 : vector<16x8x128xf32>
    %cst_38 = arith.constant dense<0.000000e+00> : vector<8x128xf32>
    %84 = vector.multi_reduction <add>, %83, %cst_38 [0] : vector<16x8x128xf32> to vector<8x128xf32>
    %85 = arith.addf %76, %84 : vector<8x128xf32>
    %c9_i32 = arith.constant 9 : i32
    %c128_i32_39 = arith.constant 128 : i32
    %86 = arith.muli %c9_i32, %c128_i32_39 : i32
    %87 = arith.index_cast %86 : i32 to index
    %c0_40 = arith.constant 0 : index
    %88 = vector.load %arg1[%87, %c0_40] : memref<2048x128xf32, #tpu.memory_space<vmem>>, vector<128x128xf32>
    %89 = vector.shape_cast %88 : vector<128x128xf32> to vector<16x8x128xf32>
    %cst_41 = arith.constant dense<0.000000e+00> : vector<8x128xf32>
    %90 = vector.multi_reduction <add>, %89, %cst_41 [0] : vector<16x8x128xf32> to vector<8x128xf32>
    %91 = arith.addf %82, %90 : vector<8x128xf32>
    %92 = arith.mulf %89, %89 : vector<16x8x128xf32>
    %cst_42 = arith.constant dense<0.000000e+00> : vector<8x128xf32>
    %93 = vector.multi_reduction <add>, %92, %cst_42 [0] : vector<16x8x128xf32> to vector<8x128xf32>
    %94 = arith.addf %85, %93 : vector<8x128xf32>
    %c10_i32 = arith.constant 10 : i32
    %c128_i32_43 = arith.constant 128 : i32
    %95 = arith.muli %c10_i32, %c128_i32_43 : i32
    %96 = arith.index_cast %95 : i32 to index
    %c0_44 = arith.constant 0 : index
    %97 = vector.load %arg1[%96, %c0_44] : memref<2048x128xf32, #tpu.memory_space<vmem>>, vector<128x128xf32>
    %98 = vector.shape_cast %97 : vector<128x128xf32> to vector<16x8x128xf32>
    %cst_45 = arith.constant dense<0.000000e+00> : vector<8x128xf32>
    %99 = vector.multi_reduction <add>, %98, %cst_45 [0] : vector<16x8x128xf32> to vector<8x128xf32>
    %100 = arith.addf %91, %99 : vector<8x128xf32>
    %101 = arith.mulf %98, %98 : vector<16x8x128xf32>
    %cst_46 = arith.constant dense<0.000000e+00> : vector<8x128xf32>
    %102 = vector.multi_reduction <add>, %101, %cst_46 [0] : vector<16x8x128xf32> to vector<8x128xf32>
    %103 = arith.addf %94, %102 : vector<8x128xf32>
    %c11_i32 = arith.constant 11 : i32
    %c128_i32_47 = arith.constant 128 : i32
    %104 = arith.muli %c11_i32, %c128_i32_47 : i32
    %105 = arith.index_cast %104 : i32 to index
    %c0_48 = arith.constant 0 : index
    %106 = vector.load %arg1[%105, %c0_48] : memref<2048x128xf32, #tpu.memory_space<vmem>>, vector<128x128xf32>
    %107 = vector.shape_cast %106 : vector<128x128xf32> to vector<16x8x128xf32>
    %cst_49 = arith.constant dense<0.000000e+00> : vector<8x128xf32>
    %108 = vector.multi_reduction <add>, %107, %cst_49 [0] : vector<16x8x128xf32> to vector<8x128xf32>
    %109 = arith.addf %100, %108 : vector<8x128xf32>
    %110 = arith.mulf %107, %107 : vector<16x8x128xf32>
    %cst_50 = arith.constant dense<0.000000e+00> : vector<8x128xf32>
    %111 = vector.multi_reduction <add>, %110, %cst_50 [0] : vector<16x8x128xf32> to vector<8x128xf32>
    %112 = arith.addf %103, %111 : vector<8x128xf32>
    %c12_i32 = arith.constant 12 : i32
    %c128_i32_51 = arith.constant 128 : i32
    %113 = arith.muli %c12_i32, %c128_i32_51 : i32
    %114 = arith.index_cast %113 : i32 to index
    %c0_52 = arith.constant 0 : index
    %115 = vector.load %arg1[%114, %c0_52] : memref<2048x128xf32, #tpu.memory_space<vmem>>, vector<128x128xf32>
    %116 = vector.shape_cast %115 : vector<128x128xf32> to vector<16x8x128xf32>
    %cst_53 = arith.constant dense<0.000000e+00> : vector<8x128xf32>
    %117 = vector.multi_reduction <add>, %116, %cst_53 [0] : vector<16x8x128xf32> to vector<8x128xf32>
    %118 = arith.addf %109, %117 : vector<8x128xf32>
    %119 = arith.mulf %116, %116 : vector<16x8x128xf32>
    %cst_54 = arith.constant dense<0.000000e+00> : vector<8x128xf32>
    %120 = vector.multi_reduction <add>, %119, %cst_54 [0] : vector<16x8x128xf32> to vector<8x128xf32>
    %121 = arith.addf %112, %120 : vector<8x128xf32>
    %c13_i32 = arith.constant 13 : i32
    %c128_i32_55 = arith.constant 128 : i32
    %122 = arith.muli %c13_i32, %c128_i32_55 : i32
    %123 = arith.index_cast %122 : i32 to index
    %c0_56 = arith.constant 0 : index
    %124 = vector.load %arg1[%123, %c0_56] : memref<2048x128xf32, #tpu.memory_space<vmem>>, vector<128x128xf32>
    %125 = vector.shape_cast %124 : vector<128x128xf32> to vector<16x8x128xf32>
    %cst_57 = arith.constant dense<0.000000e+00> : vector<8x128xf32>
    %126 = vector.multi_reduction <add>, %125, %cst_57 [0] : vector<16x8x128xf32> to vector<8x128xf32>
    %127 = arith.addf %118, %126 : vector<8x128xf32>
    %128 = arith.mulf %125, %125 : vector<16x8x128xf32>
    %cst_58 = arith.constant dense<0.000000e+00> : vector<8x128xf32>
    %129 = vector.multi_reduction <add>, %128, %cst_58 [0] : vector<16x8x128xf32> to vector<8x128xf32>
    %130 = arith.addf %121, %129 : vector<8x128xf32>
    %c14_i32 = arith.constant 14 : i32
    %c128_i32_59 = arith.constant 128 : i32
    %131 = arith.muli %c14_i32, %c128_i32_59 : i32
    %132 = arith.index_cast %131 : i32 to index
    %c0_60 = arith.constant 0 : index
    %133 = vector.load %arg1[%132, %c0_60] : memref<2048x128xf32, #tpu.memory_space<vmem>>, vector<128x128xf32>
    %134 = vector.shape_cast %133 : vector<128x128xf32> to vector<16x8x128xf32>
    %cst_61 = arith.constant dense<0.000000e+00> : vector<8x128xf32>
    %135 = vector.multi_reduction <add>, %134, %cst_61 [0] : vector<16x8x128xf32> to vector<8x128xf32>
    %136 = arith.addf %127, %135 : vector<8x128xf32>
    %137 = arith.mulf %134, %134 : vector<16x8x128xf32>
    %cst_62 = arith.constant dense<0.000000e+00> : vector<8x128xf32>
    %138 = vector.multi_reduction <add>, %137, %cst_62 [0] : vector<16x8x128xf32> to vector<8x128xf32>
    %139 = arith.addf %130, %138 : vector<8x128xf32>
    %c15_i32 = arith.constant 15 : i32
    %c128_i32_63 = arith.constant 128 : i32
    %140 = arith.muli %c15_i32, %c128_i32_63 : i32
    %141 = arith.index_cast %140 : i32 to index
    %c0_64 = arith.constant 0 : index
    %142 = vector.load %arg1[%141, %c0_64] : memref<2048x128xf32, #tpu.memory_space<vmem>>, vector<128x128xf32>
    %143 = vector.shape_cast %142 : vector<128x128xf32> to vector<16x8x128xf32>
    %cst_65 = arith.constant dense<0.000000e+00> : vector<8x128xf32>
    %144 = vector.multi_reduction <add>, %143, %cst_65 [0] : vector<16x8x128xf32> to vector<8x128xf32>
    %145 = arith.addf %136, %144 : vector<8x128xf32>
    %146 = arith.mulf %143, %143 : vector<16x8x128xf32>
    %cst_66 = arith.constant dense<0.000000e+00> : vector<8x128xf32>
    %147 = vector.multi_reduction <add>, %146, %cst_66 [0] : vector<16x8x128xf32> to vector<8x128xf32>
    %148 = arith.addf %139, %147 : vector<8x128xf32>
    %c16_i32 = arith.constant 16 : i32
    %c0_67 = arith.constant 0 : index
    %c0_68 = arith.constant 0 : index
    %149 = vector.load %arg3[%c0_67, %c0_68] : memref<8x128xf32, #tpu.memory_space<vmem>>, vector<8x128xf32>
    tpu.vector_store %arg3[%c0_67, %c0_68], %145 {strides = array<i32>} : memref<8x128xf32, #tpu.memory_space<vmem>>, vector<8x128xf32>,
    %c0_69 = arith.constant 0 : index
    %c0_70 = arith.constant 0 : index
    %150 = vector.load %arg4[%c0_69, %c0_70] : memref<8x128xf32, #tpu.memory_space<vmem>>, vector<8x128xf32>
    tpu.vector_store %arg4[%c0_69, %c0_70], %148 {strides = array<i32>} : memref<8x128xf32, #tpu.memory_space<vmem>>, vector<8x128xf32>,
    %c0_i32_71 = arith.constant 0 : i32
    %151 = arith.cmpi eq, %arg0, %c0_i32_71 : i32
    %152 = arith.extui %151 : i1 to i32
    %c0_i32_72 = arith.constant 0 : i32
    %153 = arith.cmpi ne, %152, %c0_i32_72 : i32
    scf.if %153 {
      %c0_73 = arith.constant 0 : index
      %c0_74 = arith.constant 0 : index
      %154 = vector.load %arg3[%c0_73, %c0_74] : memref<8x128xf32, #tpu.memory_space<vmem>>, vector<8x128xf32>
      %155 = vector.shape_cast %154 : vector<8x128xf32> to vector<1x8x128xf32>
      %cst_75 = arith.constant dense<0.000000e+00> : vector<1xf32>
      %156 = vector.multi_reduction <add>, %155, %cst_75 [1, 2] : vector<1x8x128xf32> to vector<1xf32>
      %157 = vector.shape_cast %156 : vector<1xf32> to vector<1x1x1xf32>
      %158 = vector.extract %157[0, 0, 0] : f32 from vector<1x1x1xf32>
      %c0_76 = arith.constant 0 : index
      %c0_77 = arith.constant 0 : index
      %159 = vector.load %arg4[%c0_76, %c0_77] : memref<8x128xf32, #tpu.memory_space<vmem>>, vector<8x128xf32>
      %160 = vector.shape_cast %159 : vector<8x128xf32> to vector<1x8x128xf32>
      %cst_78 = arith.constant dense<0.000000e+00> : vector<1xf32>
      %161 = vector.multi_reduction <add>, %160, %cst_78 [1, 2] : vector<1x8x128xf32> to vector<1xf32>
      %162 = vector.shape_cast %161 : vector<1xf32> to vector<1x1x1xf32>
      %163 = vector.extract %162[0, 0, 0] : f32 from vector<1x1x1xf32>
      %cst_79 = arith.constant 2.621440e+05 : f32
      %164 = arith.divf %158, %cst_79 : f32
      %cst_80 = arith.constant 2.621440e+05 : f32
      %165 = arith.mulf %cst_80, %164 : f32
      %166 = arith.mulf %165, %164 : f32
      %167 = arith.subf %163, %166 : f32
      %cst_81 = arith.constant 2.621430e+05 : f32
      %168 = arith.divf %167, %cst_81 : f32
      %cst_82 = arith.constant 0.000000e+00 : f32
      %169 = arith.maximumf %168, %cst_82 : f32
      %170 = math.sqrt %169 : f32
      %171 = arith.addf %164, %170 : f32
      %172 = vector.broadcast %171 : f32 to vector<8x128xf32>
      %c0_83 = arith.constant 0 : index
      %c0_84 = arith.constant 0 : index
      %173 = vector.load %arg2[%c0_83, %c0_84] : memref<8x128xf32, #tpu.memory_space<vmem>>, vector<8x128xf32>
      tpu.vector_store %arg2[%c0_83, %c0_84], %172 {strides = array<i32>} : memref<8x128xf32, #tpu.memory_space<vmem>>, vector<8x128xf32>,
    } else {
    }
    return
  }
  func.func @transform_0(%arg0: i32) -> (i32, i32) {
    %c0_i32 = arith.constant 0 : i32
    %c0_i32_0 = arith.constant 0 : i32
    return %arg0, %c0_i32 : i32, i32
  }
  func.func @transform_1(%arg0: i32) -> (i32, i32) {
    %c0_i32 = arith.constant 0 : i32
    %c0_i32_0 = arith.constant 0 : i32
    %c0_i32_1 = arith.constant 0 : i32
    return %c0_i32, %c0_i32_0 : i32, i32
  }
}

</mosaic_0001>

<bundles_post_ra>
// kernel: tpu_custom_call.1
= control target key start
LH: loop header
LB: loop body
LE: loop exit
PB: predicated region body
PF: predicated region fallthrough
CT: control target
= control target key end

     0   :  { %6 = vsyncpa [#allocation5], 0  ;;  %s2463_s0 = inlined_call_operand.hbm [shape: f32[2048,128], index: 0, kind: input, shape index: {}]   ;;  %s2464_s1 = inlined_call_operand.hbm [shape: f32[8,128], index: 1, kind: output, shape index: {}]  }
   0x1   :  { %7 = vsyncpa [#allocation6], 0  ;;  %s1178_s6 = smov [#allocation4]   ;;  %s1130_s10 = scalar_lea.hbm %s2463_s0, 32768 }
   0x2   :  { %s13_s7 = sshll.u32 %s1178_s6, 4  ;;  %p1131_p0 = scmp.ne.s32.totalorder %s2463_s0, %s1130_s10  ;;  %s14_s7 = int_to_ptr.vmem [resolvable:$true] %s13_s7 }
   0x3   :  { %p1134_p1 = scmp.lt.u32.totalorder %s1130_s10, %s2463_s0 }
   0x5   :  { %p1136_p2 = pnand %p1134_p1, %p1131_p0 }
   0x7   :  { %1139 = shalt.err (!%p1136_p2)
}
   0x8   :  { %s1140_s15 = scalar_lea.vmem %s14_s7, 32768  ;;  %p1145_p4 = scmp.lt.s32.totalorder %s14_s7, %s14_s7 }
   0x9   :  { %p1141_p3 = scmp.ne.s32.totalorder %s14_s7, %s1140_s15  ;;  %p1146_p5 = scmp.lt.s32.totalorder %s1140_s15, %s1140_s15 }
   0xb   :  { %p1147_p6 = por %p1146_p5, %p1145_p4 }
   0xd   :  { %p1148_p7 = pnand %p1147_p6, %p1141_p3 }
   0xf   :  { %1151 = shalt.err (!%p1148_p7)
}
  0x10   :  { %s1179_s16 = smov 128   ;;  %s1180_s17 = smov 8  }
  0x11   :  { %19 = dma.hbm_to_vmem [thread:$0]  %s2463_s0, 32768, %s14_s7, [#allocation5], %s1179_s16, %s1179_s16, %s1180_s17  }
  0x12   :  { %1174 = dma.done.wait [#allocation5], 32768  }
  0x13   :  { %1175 = vsyncadd [#allocation5], 4294934528  ;;  %v31_v0 = vld [vmem:[#allocation4] sm:$0xff]  ;;  %v32_v1 = vld [vmem:[#allocation4 + $0x8] sm:$0xff]  ;;  %s1181_s26 = smov 0.0   ;;  %s1182_s28 = smov [#allocation7]  }
  0x14   :  { %v33_v2 = vld [vmem:[#allocation4 + $0x10] sm:$0xff]  ;;  %v47_v3 = vadd.f32 %v32_v1, %v31_v0  ;;  %v63_v4 = vmul.f32 %v31_v0, %v31_v0  ;;  %v64_v5 = vmul.f32 %v32_v1, %v32_v1  ;;  %v34_v6 = vld [vmem:[#allocation4 + $0x18] sm:$0xff]  ;;  %v35_v9 = vld [vmem:[#allocation4 + $0x20] sm:$0xff]  ;;  %s1108_s29 = sshll.u32 %s1182_s28, 4  ;;  %s1109_s29 = int_to_ptr.vmem [resolvable:$true] %s1108_s29 }
  0x15   :  { %v65_v7 = vmul.f32 %v33_v2, %v33_v2  ;;  %v66_v10 = vmul.f32 %v34_v6, %v34_v6  ;;  %v95_v13 = vld [vmem:[#allocation4 + $0x80] sm:$0xff]  ;;  %v96_v14 = vld [vmem:[#allocation4 + $0x88] sm:$0xff]  ;;  %v37_v16 = vld [vmem:[#allocation4 + $0x30] sm:$0xff]  ;;  %v67_v19 = vmul.f32 %v35_v9, %v35_v9  ;;  %s1152_s3 = scalar_lea.vmem %s1109_s29, 128  ;;  %p1157_p9 = scmp.lt.s32.totalorder %s1109_s29, %s1109_s29 }
  0x16   :  { %v48_v8 = vadd.f32 %v47_v3, %v33_v2  ;;  %v79_v11 = vadd.f32 %v64_v5, %v63_v4  ;;  %v36_v15 = vld [vmem:[#allocation4 + $0x28] sm:$0xff]  ;;  %v97_v17 = vld [vmem:[#allocation4 + $0x90] sm:$0xff]  ;;  %v111_v18 = vadd.f32 %v96_v14, %v95_v13  ;;  %v38_v21 = vld [vmem:[#allocation4 + $0x38] sm:$0xff]  ;;  %v69_v26 = vmul.f32 %v37_v16, %v37_v16  ;;  %p1153_p8 = scmp.ne.s32.totalorder %s1109_s29, %s1152_s3  ;;  %p1158_p10 = scmp.lt.s32.totalorder %s1152_s3, %s1152_s3 }
  0x17   :  { %v39_v22 = vld [vmem:[#allocation4 + $0x40] sm:$0xff]  ;;  %v98_v24 = vld [vmem:[#allocation4 + $0x98] sm:$0xff]  ;;  %v68_v25 = vmul.f32 %v36_v15, %v36_v15  ;;  %v40_v27 = vld [vmem:[#allocation4 + $0x48] sm:$0xff]  ;;  %v70_v30 = vmul.f32 %v38_v21, %v38_v21  ;;  %v127_v38 = vmul.f32 %v95_v13, %v95_v13  ;;  %v128_v39 = vmul.f32 %v96_v14, %v96_v14 }
  0x18   :  { %v49_v12 = vadd.f32 %v48_v8, %v34_v6  ;;  %v80_v20 = vadd.f32 %v79_v11, %v65_v7  ;;  %v1205_v28 = vld [vmem:[#allocation4 + $0x50] sm:$0xff]  ;;  %v112_v29 = vadd.f32 %v111_v18, %v97_v17  ;;  %v71_v31 = vmul.f32 %v39_v22, %v39_v22  ;;  %v1207_v33 = vld [vmem:[#allocation4 + $0x58] sm:$0xff]  ;;  %v1209_v34 = vld [vmem:[#allocation4 + $0x60] sm:$0xff]  ;;  %p1159_p11 = por %p1158_p10, %p1157_p9 }
  0x19   :  { %v99_v36 = vld [vmem:[#allocation4 + $0xa0] sm:$0xff]  ;;  %v1211_v37 = vmul.f32 %v40_v27, %v40_v27  ;;  %v1213_v40 = vld [vmem:[#allocation4 + $0x68] sm:$0xff]  ;;  %v1215_v41 = vld [vmem:[#allocation4 + $0x70] sm:$0xff]  ;;  %v1221_v44 = vmul.f32 %v1205_v28, %v1205_v28  ;;  %v1225_v45 = vmul.f32 %v1207_v33, %v1207_v33  ;;  %v1233_v51 = vmul.f32 %v1209_v34, %v1209_v34 }
  0x1a   :  { %v50_v23 = vadd.f32 %v49_v12, %v35_v9  ;;  %v81_v32 = vadd.f32 %v80_v20, %v66_v10  ;;  %v113_v42 = vadd.f32 %v112_v29, %v98_v24  ;;  %v1217_v43 = vld [vmem:[#allocation4 + $0x100] sm:$0xff]  ;;  %v100_v48 = vld [vmem:[#allocation4 + $0xa8] sm:$0xff]  ;;  %v1229_v50 = vld [vmem:[#allocation4 + $0x110] sm:$0xff]  ;;  %v1237_v52 = vmul.f32 %v1213_v40, %v1213_v40  ;;  %p1160_p12 = pnand %p1159_p11, %p1153_p8 }
  0x1b   :  { %v1227_v49 = vld [vmem:[#allocation4 + $0x108] sm:$0xff]  ;;  %v129_v53 = vmul.f32 %v97_v17, %v97_v17  ;;  %v1239_v54 = vld [vmem:[#allocation4 + $0x78] sm:$0xff]  ;;  %v1245_v57 = vmul.f32 %v1215_v41, %v1215_v41  ;;  %v101_v60 = vld [vmem:[#allocation4 + $0xb0] sm:$0xff]  ;;  %v130_v63 = vmul.f32 %v98_v24, %v98_v24  ;;  %v143_v0 = vadd.f32 %v128_v39, %v127_v38 }
  0x1c   :  { %v51_v35 = vadd.f32 %v50_v23, %v36_v15  ;;  %v82_v46 = vadd.f32 %v81_v32, %v67_v19  ;;  %v114_v55 = vadd.f32 %v113_v42, %v99_v36  ;;  %v175_v56 = vadd.f32 %v1227_v49, %v1217_v43  ;;  %v1247_v61 = vld [vmem:[#allocation4 + $0x118] sm:$0xff]  ;;  %v103_v7 = vld [vmem:[#allocation4 + $0xc0] sm:$0xff]  ;;  %v1259_v15 = vld [vmem:[#allocation4 + $0x188] sm:$0xff] }
  0x1d   :  { %v1251_v62 = vmul.f32 %v1239_v54, %v1239_v54  ;;  %v131_v4 = vmul.f32 %v99_v36, %v99_v36  ;;  %v102_v6 = vld [vmem:[#allocation4 + $0xb8] sm:$0xff]  ;;  %v1254_v8 = vld [vmem:[#allocation4 + $0x120] sm:$0xff]  ;;  %v132_v9 = vmul.f32 %v100_v48, %v100_v48  ;;  %v133_v10 = vmul.f32 %v101_v60, %v101_v60  ;;  %v104_v20 = vld [vmem:[#allocation4 + $0xc8] sm:$0xff] }
  0x1e   :  { %v52_v47 = vadd.f32 %v51_v35, %v37_v16  ;;  %v83_v58 = vadd.f32 %v82_v46, %v68_v25  ;;  %v115_v1 = vadd.f32 %v114_v55, %v100_v48  ;;  %v176_v2 = vadd.f32 %v175_v56, %v1229_v50  ;;  %v1257_v14 = vld [vmem:[#allocation4 + $0x180] sm:$0xff]  ;;  %v1261_v16 = vld [vmem:[#allocation4 + $0x190] sm:$0xff]  ;;  %v1270_v32 = vld [vmem:[#allocation4 + $0x198] sm:$0xff] }
  0x1f   :  { %v144_v11 = vadd.f32 %v143_v0, %v129_v53  ;;  %v134_v18 = vmul.f32 %v102_v6, %v102_v6  ;;  %v1267_v23 = vmul.f32 %v103_v7, %v103_v7  ;;  %v105_v25 = vld [vmem:[#allocation4 + $0xd0] sm:$0xff]  ;;  %v1272_v36 = vmul.f32 %v104_v20, %v104_v20  ;;  %v1280_v48 = vld [vmem:[#allocation4 + $0xe8] sm:$0xff]  ;;  %v1283_v56 = vld [vmem:[#allocation4 + $0x1a0] sm:$0xff] }
  0x20   :  { %v53_v59 = vadd.f32 %v52_v47, %v38_v21  ;;  %v84_v3 = vadd.f32 %v83_v58, %v69_v26  ;;  %v116_v12 = vadd.f32 %v115_v1, %v101_v60  ;;  %v177_v13 = vadd.f32 %v176_v2, %v1247_v61  ;;  %v1263_v21 = vld [vmem:[#allocation4 + $0x128] sm:$0xff]  ;;  %v1275_v38 = vld [vmem:[#allocation4 + $0x130] sm:$0xff]  ;;  %v107_v47 = vld [vmem:[#allocation4 + $0xe0] sm:$0xff] }
  0x21   :  { %v145_v24 = vadd.f32 %v144_v11, %v130_v63  ;;  %v1278_v42 = vmul.f32 %v105_v25, %v105_v25  ;;  %v1291_v60 = vld [vmem:[#allocation4 + $0x200] sm:$0xff]  ;;  %v1293_v63 = vld [vmem:[#allocation4 + $0x208] sm:$0xff]  ;;  %v1295_v0 = vmul.f32 %v107_v47, %v107_v47  ;;  %v1299_v1 = vmul.f32 %v1280_v48, %v1280_v48 }
  0x22   :  { %v54_v5 = vadd.f32 %v53_v59, %v39_v22  ;;  %v85_v17 = vadd.f32 %v84_v3, %v70_v30  ;;  %v239_v22 = vadd.f32 %v1259_v15, %v1257_v14  ;;  %v117_v26 = vadd.f32 %v116_v12, %v102_v6  ;;  %v106_v30 = vld [vmem:[#allocation4 + $0xd8] sm:$0xff]  ;;  %v1301_v3 = vld [vmem:[#allocation4 + $0xf0] sm:$0xff] }
  0x23   :  { %v178_v29 = vadd.f32 %v177_v13, %v1254_v8  ;;  %v146_v46 = vadd.f32 %v145_v24, %v131_v4  ;;  %v1286_v58 = vmul.f32 %v106_v30, %v106_v30  ;;  %v1306_v6 = vld [vmem:[#allocation4 + $0x210] sm:$0xff]  ;;  %v1312_v13 = vld [vmem:[#allocation4 + $0x140] sm:$0xff] }
  0x24   :  { %v55_v19 = vadd.f32 %v54_v5, %v40_v27  ;;  %v86_v35 = vadd.f32 %v85_v17, %v71_v31  ;;  %v240_v39 = vadd.f32 %v239_v22, %v1261_v16  ;;  %v118_v53 = vadd.f32 %v117_v26, %v103_v7  ;;  %v1304_v5 = vld [vmem:[#allocation4 + $0x1a8] sm:$0xff]  ;;  %v1315_v17 = vld [vmem:[#allocation4 + $0x218] sm:$0xff] }
  0x25   :  { %v179_v55 = vadd.f32 %v178_v29, %v1263_v21  ;;  %v147_v2 = vadd.f32 %v146_v46, %v132_v9  ;;  %v303_v7 = vadd.f32 %v1293_v63, %v1291_v60  ;;  %v1321_v22 = vld [vmem:[#allocation4 + $0xf8] sm:$0xff]  ;;  %v1324_v29 = vld [vmem:[#allocation4 + $0x1b0] sm:$0xff] }
  0x26   :  { %v56_v27 = vadd.f32 %v55_v19, %v1205_v28  ;;  %v87_v31 = vadd.f32 %v86_v35, %v1211_v37  ;;  %v1288_v28 = vld [vmem:[#allocation4 + $0x138] sm:$0xff]  ;;  %v241_v59 = vadd.f32 %v240_v39, %v1270_v32  ;;  %v119_v37 = vadd.f32 %v118_v53, %v104_v20  ;;  %v1328_v35 = vld [vmem:[#allocation4 + $0x148] sm:$0xff]  ;;  %v1331_v39 = vld [vmem:[#allocation4 + $0x220] sm:$0xff] }
  0x27   :  { %v180_v4 = vadd.f32 %v179_v55, %v1275_v38  ;;  %v1319_v19 = vmul.f32 %v1301_v3, %v1301_v3  ;;  %v148_v20 = vadd.f32 %v147_v2, %v133_v10  ;;  %2617 = vst [vmem:[#allocation10_spill] sm:$0xff] %v1331_v39  ;;  %v1335_v10 = vmul.f32 %v1321_v22, %v1321_v22  ;;  %v1341_v55 = vld [vmem:[#allocation4 + $0x150] sm:$0xff]  ;;  %v1347_v2 = vld [vmem:[#allocation4 + $0x280] sm:$0xff] }
  0x28   :  { %v88_v11 = vadd.f32 %v87_v31, %v1221_v44  ;;  %v57_v12 = vadd.f32 %v56_v27, %v1207_v33  ;;  %v242_v9 = vadd.f32 %v241_v59, %v1283_v56  ;;  %v120_v24 = vadd.f32 %v119_v37, %v105_v25  ;;  %v1344_v31 = vld [vmem:[#allocation4 + $0x1b8] sm:$0xff]  ;;  %2618 = vst [vmem:[#allocation11_spill] sm:$0xff] %v1347_v2 }
  0x29   :  { %v181_v26 = vadd.f32 %v180_v4, %v1288_v28  ;;  %v304_v33 = vadd.f32 %v303_v7, %v1306_v6  ;;  %v149_v46 = vadd.f32 %v148_v20, %v134_v18  ;;  %v1339_v25 = vmul.f32 %v1217_v43, %v1217_v43  ;;  %v1352_v7 = vld [vmem:[#allocation4 + $0x228] sm:$0xff] }
  0x2a   :  { %v89_v44 = vadd.f32 %v88_v11, %v1225_v45  ;;  %v243_v27 = vadd.f32 %v242_v9, %v1304_v5  ;;  %v121_v53 = vadd.f32 %v120_v24, %v106_v30  ;;  %v58_v4 = vadd.f32 %v57_v12, %v1209_v34  ;;  %2619 = vst [vmem:[#allocation12_spill] sm:$0xff] %v1352_v7  ;;  %v1354_v43 = vld [vmem:[#allocation4 + $0x288] sm:$0xff]  ;;  %v1356_v30 = vld [vmem:[#allocation4 + $0x290] sm:$0xff] }
  0x2b   :  { %v182_v45 = vadd.f32 %v181_v26, %v1312_v13  ;;  %v305_v59 = vadd.f32 %v304_v33, %v1315_v17  ;;  %2620 = vst [vmem:[#allocation13_spill] sm:$0xff] %v1354_v43  ;;  %2621 = vst [vmem:[#allocation14_spill] sm:$0xff] %v1356_v30  ;;  %v150_v11 = vadd.f32 %v149_v46, %v1267_v23  ;;  %v1369_v26 = vld [vmem:[#allocation4 + $0x158] sm:$0xff]  ;;  %v1382_v46 = vld [vmem:[#allocation4 + $0x160] sm:$0xff] }
  0x2c   :  { %v90_v37 = vadd.f32 %v89_v44, %v1233_v51  ;;  %v244_v18 = vadd.f32 %v243_v27, %v1324_v29  ;;  %v1361_v9 = vmul.f32 %v1227_v49, %v1227_v49  ;;  %v122_v20 = vadd.f32 %v121_v53, %v107_v47  ;;  %v1364_v51 = vld [vmem:[#allocation4 + $0x1c0] sm:$0xff]  ;;  %v1372_v44 = vld [vmem:[#allocation4 + $0x230] sm:$0xff]  ;;  %v1374_v23 = vld [vmem:[#allocation4 + $0x298] sm:$0xff] }
  0x2d   :  { %v183_v24 = vadd.f32 %v182_v45, %v1328_v35  ;;  %v306_v34 = vadd.f32 %v305_v59, %v1331_v39  ;;  %v367_v12 = vadd.f32 %v1354_v43, %v1347_v2  ;;  %2622 = vst [vmem:[#allocation15_spill] sm:$0xff] %v1374_v23  ;;  %v151_v47 = vadd.f32 %v150_v11, %v1272_v36  ;;  %v1385_v45 = vld [vmem:[#allocation4 + $0x1c8] sm:$0xff]  ;;  %v1394_v36 = vld [vmem:[#allocation4 + $0x1d0] sm:$0xff]  ;;  %v1399_v11 = vld [vmem:[#allocation4 + $0x2a0] sm:$0xff] }
  0x2e   :  { %v245_v33 = vadd.f32 %v244_v18, %v1344_v31  ;;  %v91_v49 = vadd.f32 %v90_v37, %v1237_v52  ;;  %v1380_v27 = vmul.f32 %v1229_v50, %v1229_v50  ;;  %v1391_v43 = vmul.f32 %v1247_v61, %v1247_v61  ;;  %v1397_v37 = vld [vmem:[#allocation4 + $0x238] sm:$0xff]  ;;  %2624 = vst [vmem:[#allocation17_spill] sm:$0xff] %v1399_v11  ;;  %v1409_v2 = vld [vmem:[#allocation4 + $0x308] sm:$0xff]  ;;  %v1414_v39 = vld [vmem:[#allocation4 + $0x240] sm:$0xff] }
  0x2f   :  { %v184_v53 = vadd.f32 %v183_v24, %v1341_v55  ;;  %v307_v59 = vadd.f32 %v306_v34, %v1352_v7  ;;  %v368_v18 = vadd.f32 %v367_v12, %v1356_v30  ;;  %v59_v52 = vadd.f32 %v58_v4, %v1213_v40  ;;  %2623 = vst [vmem:[#allocation16_spill] sm:$0xff] %v1397_v37  ;;  %v1407_v4 = vld [vmem:[#allocation4 + $0x300] sm:$0xff] }
  0x30   :  { %v246_v50 = vadd.f32 %v245_v33, %v1364_v51  ;;  %v92_v24 = vadd.f32 %v91_v49, %v1245_v57  ;;  %v152_v34 = vadd.f32 %v151_v47, %v1278_v42  ;;  %v123_v12 = vadd.f32 %v122_v20, %v1280_v48  ;;  %2625 = vst [vmem:[#allocation18_spill] sm:$0xff] %v1407_v4  ;;  %v1411_v33 = vld [vmem:[#allocation4 + $0x310] sm:$0xff]  ;;  %v1416_v57 = vld [vmem:[#allocation4 + $0x2a8] sm:$0xff]  ;;  %v1425_v47 = vld [vmem:[#allocation4 + $0x1d8] sm:$0xff] }
  0x31   :  { %v185_v30 = vadd.f32 %v184_v53, %v1369_v26  ;;  %v308_v61 = vadd.f32 %v307_v59, %v1372_v44  ;;  %v369_v40 = vadd.f32 %v368_v18, %v1374_v23  ;;  %2626 = vst [vmem:[#allocation19_spill] sm:$0xff] %v1409_v2  ;;  %2627 = vst [vmem:[#allocation20_spill] sm:$0xff] %v1411_v33  ;;  %v1429_v18 = vld [vmem:[#allocation4 + $0x318] sm:$0xff]  ;;  %v1455_v23 = vld [vmem:[#allocation4 + $0x320] sm:$0xff] }
  0x32   :  { %v247_v7 = vadd.f32 %v246_v50, %v1385_v45  ;;  %2628 = vst [vmem:[#allocation21_spill] sm:$0xff] %v1414_v39  ;;  %2629 = vst [vmem:[#allocation22_spill] sm:$0xff] %v1416_v57  ;;  %v431_v42 = vadd.f32 %v1409_v2, %v1407_v4  ;;  %v1421_v48 = vadd.f32 %v92_v24, %v1251_v62  ;;  %v1435_v2 = vld [vmem:[#allocation4 + $0x168] sm:$0xff]  ;;  %v1451_v4 = vld [vmem:[#allocation4 + $0x250] sm:$0xff] }
  0x33   :  { %v153_v20 = vadd.f32 %v152_v34, %v1286_v58  ;;  %v186_v49 = vadd.f32 %v185_v30, %v1382_v46  ;;  %v309_v53 = vadd.f32 %v308_v61, %v1397_v37  ;;  %v370_v59 = vadd.f32 %v369_v40, %v1399_v11  ;;  %2630 = vst [vmem:[#allocation23_spill] sm:$0xff] %v1429_v18  ;;  %v1438_v24 = vld [vmem:[#allocation4 + $0x248] sm:$0xff]  ;;  %v1440_v58 = vld [vmem:[#allocation4 + $0x2b0] sm:$0xff] }
  0x34   :  { %v1433_v50 = vmul.f32 %v1254_v8, %v1254_v8  ;;  %v248_v62 = vadd.f32 %v247_v7, %v1394_v36  ;;  %2631 = vst [vmem:[#allocation24_spill] sm:$0xff] %v1438_v24  ;;  %2632 = vst [vmem:[#allocation25_spill] sm:$0xff] %v1440_v58  ;;  %v432_v30 = vadd.f32 %v431_v42, %v1411_v33  ;;  %v1449_v8 = vld [vmem:[#allocation4 + $0x1e0] sm:$0xff]  ;;  %v1468_v33 = vld [vmem:[#allocation4 + $0x388] sm:$0xff] }
  0x35   :  { %v154_v34 = vadd.f32 %v153_v20, %v1295_v0  ;;  %v1446_v61 = vmul.f32 %v1263_v21, %v1263_v21  ;;  %v60_v40 = vadd.f32 %v59_v52, %v1215_v41  ;;  %v310_v7 = vadd.f32 %v309_v53, %v1414_v39  ;;  %2633 = vst [vmem:[#allocation26_spill] sm:$0xff] %v1455_v23  ;;  %v1463_v20 = vld [vmem:[#allocation4 + $0x2b8] sm:$0xff]  ;;  %v1466_v52 = vld [vmem:[#allocation4 + $0x380] sm:$0xff] }
  0x36   :  { %v371_v11 = vadd.f32 %v370_v59, %v1416_v57  ;;  %v1459_v42 = vmul.f32 %v1275_v38, %v1275_v38  ;;  %v124_v0 = vadd.f32 %v123_v12, %v1301_v3  ;;  %v249_v21 = vadd.f32 %v248_v62, %v1425_v47  ;;  %2634 = vst [vmem:[#allocation27_spill] sm:$0xff] %v1463_v20  ;;  %v1471_v59 = vld [vmem:[#allocation4 + $0x170] sm:$0xff]  ;;  %v1476_v12 = vld [vmem:[#allocation4 + $0x328] sm:$0xff]  ;;  %v1483_v39 = vld [vmem:[#allocation4 + $0x258] sm:$0xff] }
  0x37   :  { %v433_v41 = vadd.f32 %v432_v30, %v1429_v18  ;;  %2635 = vst [vmem:[#allocation28_spill] sm:$0xff] %v1466_v52  ;;  %2636 = vst [vmem:[#allocation29_spill] sm:$0xff] %v1468_v33  ;;  %v155_v53 = vadd.f32 %v154_v34, %v1299_v1  ;;  %v187_v57 = vadd.f32 %v186_v49, %v1435_v2  ;;  %v1478_v62 = vld [vmem:[#allocation4 + $0x390] sm:$0xff]  ;;  %v1485_v1 = vld [vmem:[#allocation4 + $0x2c0] sm:$0xff] }
  0x38   :  { %v311_v38 = vadd.f32 %v310_v7, %v1438_v24  ;;  %v372_v3 = vadd.f32 %v371_v11, %v1440_v58  ;;  %2637 = vst [vmem:[#allocation30_spill] sm:$0xff] %v1476_v12  ;;  %2638 = vst [vmem:[#allocation31_spill] sm:$0xff] %v1478_v62  ;;  %v495_v30 = vadd.f32 %v1468_v33, %v1466_v52  ;;  %v1488_v49 = vld [vmem:[#allocation4 + $0x398] sm:$0xff]  ;;  %v1494_v24 = vld [vmem:[#allocation4 + $0x1e8] sm:$0xff] }
  0x39   :  { %v250_v18 = vadd.f32 %v249_v21, %v1449_v8  ;;  %2639 = vst [vmem:[#allocation32_spill] sm:$0xff] %v1485_v1  ;;  %v434_v34 = vadd.f32 %v433_v41, %v1455_v23  ;;  %2640 = vst [vmem:[#allocation33_spill] sm:$0xff] %v1488_v49  ;;  %v156_v7 = vadd.f32 %v155_v53, %v1319_v19  ;;  %v1498_v52 = vld [vmem:[#allocation4 + $0x330] sm:$0xff]  ;;  %v1502_v23 = vld [vmem:[#allocation4 + $0x260] sm:$0xff] }
  0x3a   :  { %v207_v11 = vadd.f32 %v1361_v9, %v1339_v25  ;;  %v61_v58 = vadd.f32 %v60_v40, %v1239_v54  ;;  %v312_v33 = vadd.f32 %v311_v38, %v1451_v4  ;;  %v373_v21 = vadd.f32 %v372_v3, %v1463_v20  ;;  %2641 = vst [vmem:[#allocation34_spill] sm:$0xff] %v1498_v52  ;;  %v1504_v19 = vld [vmem:[#allocation4 + $0x2c8] sm:$0xff]  ;;  %v1507_v9 = vld [vmem:[#allocation4 + $0x3a0] sm:$0xff]  ;;  %v1511_v53 = vld [vmem:[#allocation4 + $0x178] sm:$0xff] }
  0x3b   :  { %v496_v37 = vadd.f32 %v495_v30, %v1478_v62  ;;  %v125_v41 = vadd.f32 %v124_v0, %v1321_v22  ;;  %2642 = vst [vmem:[#allocation35_spill] sm:$0xff] %v1502_v23  ;;  %2643 = vst [vmem:[#allocation36_spill] sm:$0xff] %v1504_v19  ;;  %v435_v25 = vadd.f32 %v434_v34, %v1476_v12  ;;  %v1515_v30 = vld [vmem:[#allocation4 + $0x2d0] sm:$0xff]  ;;  %v1518_v0 = vld [vmem:[#allocation4 + $0x338] sm:$0xff] }
  0x3c   :  { %2644 = vst [vmem:[#allocation37_spill] sm:$0xff] %v1507_v9  ;;  %v157_v54 = vadd.f32 %v156_v7, %v1335_v10  ;;  %v208_v40 = vadd.f32 %v207_v11, %v1380_v27  ;;  %v188_v38 = vadd.f32 %v187_v57, %v1471_v59  ;;  %v313_v3 = vadd.f32 %v312_v33, %v1483_v39  ;;  %v1521_v62 = vld [vmem:[#allocation4 + $0x400] sm:$0xff]  ;;  %v1525_v7 = vld [vmem:[#allocation4 + $0x3a8] sm:$0xff]  ;;  %v1529_v57 = vld [vmem:[#allocation4 + $0x410] sm:$0xff] }
  0x3d   :  { %2645 = vst [vmem:[#allocation38_spill] sm:$0xff] %v1515_v30  ;;  %v374_v22 = vadd.f32 %v373_v21, %v1485_v1  ;;  %2646 = vst [vmem:[#allocation39_spill] sm:$0xff] %v1518_v0  ;;  %v497_v34 = vadd.f32 %v496_v37, %v1488_v49  ;;  %v251_v10 = vadd.f32 %v250_v18, %v1494_v24  ;;  %v1527_v11 = vld [vmem:[#allocation4 + $0x408] sm:$0xff]  ;;  %v1535_v12 = vld [vmem:[#allocation4 + $0x1f0] sm:$0xff] }
  0x3e   :  { %2647 = vst [vmem:[#allocation40_spill] sm:$0xff] %v1521_v62  ;;  %v436_v27 = vadd.f32 %v435_v25, %v1498_v52  ;;  %2648 = vst [vmem:[#allocation41_spill] sm:$0xff] %v1525_v7  ;;  %v1532_v33 = vadd.f32 %v157_v54, %v1421_v48  ;;  %v209_v21 = vadd.f32 %v208_v40, %v1391_v43  ;;  %v1537_v37 = vld [vmem:[#allocation4 + $0x268] sm:$0xff]  ;;  %v1541_v25 = vld [vmem:[#allocation4 + $0x340] sm:$0xff] }
  0x3f   :  { %2649 = vst [vmem:[#allocation42_spill] sm:$0xff] %v1527_v11  ;;  %2650 = vst [vmem:[#allocation43_spill] sm:$0xff] %v1529_v57  ;;  %v314_v49 = vadd.f32 %v313_v3, %v1502_v23  ;;  %v375_v18 = vadd.f32 %v374_v22, %v1504_v19  ;;  %v498_v52 = vadd.f32 %v497_v34, %v1507_v9  ;;  %v1546_v20 = vld [vmem:[#allocation4 + $0x2d8] sm:$0xff]  ;;  %v1549_v43 = vld [vmem:[#allocation4 + $0x3b0] sm:$0xff] }
  0x40   :  { %2651 = vst [vmem:[#allocation44_spill] sm:$0xff] %v1541_v25  ;;  %v559_v1 = vadd.f32 %v1527_v11, %v1521_v62  ;;  %2652 = vst [vmem:[#allocation45_spill] sm:$0xff] %v1546_v20  ;;  %v437_v48 = vadd.f32 %v436_v27, %v1518_v0  ;;  %v1551_v54 = vld [vmem:[#allocation4 + $0x418] sm:$0xff]  ;;  %v198_v40 = vmul.f32 %v1288_v28, %v1288_v28  ;;  %v1558_v9 = vld [vmem:[#allocation4 + $0x2e0] sm:$0xff] }
  0x41   :  { %2653 = vst [vmem:[#allocation46_spill] sm:$0xff] %v1549_v43  ;;  %2654 = vst [vmem:[#allocation47_spill] sm:$0xff] %v1551_v54  ;;  %v199_v3 = vmul.f32 %v1312_v13, %v1312_v13  ;;  %v210_v22 = vadd.f32 %v209_v21, %v1433_v50  ;;  %v126_v34 = vadd.f32 %v125_v41, %v61_v58  ;;  %v1561_v62 = vld [vmem:[#allocation4 + $0x348] sm:$0xff]  ;;  %v1566_v23 = vld [vmem:[#allocation4 + $0x1f8] sm:$0xff] }
  0x42   :  { %2655 = vst [vmem:[#allocation48_spill] sm:$0xff] %v1558_v9  ;;  %v376_v11 = vadd.f32 %v375_v18, %v1515_v30  ;;  %2656 = vst [vmem:[#allocation49_spill] sm:$0xff] %v1561_v62  ;;  %v499_v27 = vadd.f32 %v498_v52, %v1525_v7  ;;  %v560_v0 = vadd.f32 %v559_v1, %v1529_v57  ;;  %v1569_v13 = vld [vmem:[#allocation4 + $0x350] sm:$0xff]  ;;  %v1572_v58 = vld [vmem:[#allocation4 + $0x3b8] sm:$0xff] }
  0x43   :  { %v189_v19 = vadd.f32 %v188_v38, %v1511_v53  ;;  %v252_v28 = vadd.f32 %v251_v10, %v1535_v12  ;;  %2657 = vst [vmem:[#allocation50_spill] sm:$0xff] %v1569_v13  ;;  %v438_v50 = vadd.f32 %v437_v48, %v1541_v25  ;;  %2658 = vst [vmem:[#allocation51_spill] sm:$0xff] %v1572_v58  ;;  %v1574_v41 = vld [vmem:[#allocation4 + $0x420] sm:$0xff]  ;;  %v1583_v10 = vld [vmem:[#allocation4 + $0x488] sm:$0xff] }
  0x44   :  { %2659 = vst [vmem:[#allocation52_spill] sm:$0xff] %v1574_v41  ;;  %v211_v21 = vadd.f32 %v210_v22, %v1446_v61  ;;  %v315_v52 = vadd.f32 %v314_v49, %v1537_v37  ;;  %v377_v1 = vadd.f32 %v376_v11, %v1546_v20  ;;  %v500_v38 = vadd.f32 %v499_v27, %v1549_v43  ;;  %v1581_v57 = vld [vmem:[#allocation4 + $0x480] sm:$0xff]  ;;  %v1585_v7 = vld [vmem:[#allocation4 + $0x490] sm:$0xff]  ;;  %v1592_v61 = vld [vmem:[#allocation4 + $0x428] sm:$0xff] }
  0x45   :  { %v561_v18 = vadd.f32 %v560_v0, %v1551_v54  ;;  %2660 = vst [vmem:[#allocation53_spill] sm:$0xff] %v1581_v57  ;;  %2661 = vst [vmem:[#allocation54_spill] sm:$0xff] %v1583_v10  ;;  %v1587_v48 = vld [vmem:[#allocation4 + $0x270] sm:$0xff]  ;;  %v439_v25 = vadd.f32 %v438_v50, %v1561_v62  ;;  %v1590_v30 = vld [vmem:[#allocation4 + $0x3c0] sm:$0xff]  ;;  %v623_v49 = vadd.f32 %v1583_v10, %v1581_v57 }
  0x46   :  { %2662 = vst [vmem:[#allocation55_spill] sm:$0xff] %v1585_v7  ;;  %2663 = vst [vmem:[#allocation56_spill] sm:$0xff] %v1587_v48  ;;  %v200_v0 = vmul.f32 %v1328_v35, %v1328_v35  ;;  %v212_v11 = vadd.f32 %v211_v21, %v1459_v42  ;;  %v1599_v22 = vld [vmem:[#allocation4 + $0x2e8] sm:$0xff]  ;;  %v378_v27 = vadd.f32 %v377_v1, %v1558_v9  ;;  %v1602_v54 = vld [vmem:[#allocation4 + $0x358] sm:$0xff] }
  0x47   :  { %2664 = vst [vmem:[#allocation57_spill] sm:$0xff] %v1590_v30  ;;  %2665 = vst [vmem:[#allocation58_spill] sm:$0xff] %v1592_v61  ;;  %v501_v50 = vadd.f32 %v500_v38, %v1572_v58  ;;  %v562_v43 = vadd.f32 %v561_v18, %v1574_v41  ;;  %v1606_v62 = vld [vmem:[#allocation4 + $0x498] sm:$0xff]  ;;  %v201_v10 = vmul.f32 %v1341_v55, %v1341_v55  ;;  %v1611_v20 = vld [vmem:[#allocation4 + $0x3c8] sm:$0xff] }
  0x48   :  { %2666 = vst [vmem:[#allocation59_spill] sm:$0xff] %v1599_v22  ;;  %2667 = vst [vmem:[#allocation60_spill] sm:$0xff] %v1602_v54  ;;  %v190_v57 = vadd.f32 %v189_v19, %v126_v34  ;;  %v440_v35 = vadd.f32 %v439_v25, %v1569_v13  ;;  %v1613_v42 = vld [vmem:[#allocation4 + $0x430] sm:$0xff]  ;;  %v624_v21 = vadd.f32 %v623_v49, %v1585_v7  ;;  %v1617_v38 = vld [vmem:[#allocation4 + $0x278] sm:$0xff] }
  0x49   :  { %2668 = vst [vmem:[#allocation61_spill] sm:$0xff] %v1606_v62  ;;  %2669 = vst [vmem:[#allocation62_spill] sm:$0xff] %v1611_v20  ;;  %v213_v1 = vadd.f32 %v212_v11, %v198_v40  ;;  %v253_v9 = vadd.f32 %v252_v28, %v1566_v23  ;;  %v316_v18 = vadd.f32 %v315_v52, %v1587_v48  ;;  %v1620_v41 = vld [vmem:[#allocation4 + $0x2f0] sm:$0xff]  ;;  %v1622_v58 = vld [vmem:[#allocation4 + $0x360] sm:$0xff] }
  0x4a   :  { %2670 = vst [vmem:[#allocation63_spill] sm:$0xff] %v1613_v42  ;;  %2671 = vst [vmem:[#allocation64_spill] sm:$0xff] %v1622_v58  ;;  %v1624_v55 = vld [vmem:[#allocation4 + $0x3d0] sm:$0xff]  ;;  %v502_v19 = vadd.f32 %v501_v50, %v1590_v30  ;;  %v563_v25 = vadd.f32 %v562_v43, %v1592_v61  ;;  %v1628_v34 = vld [vmem:[#allocation4 + $0x4a0] sm:$0xff]  ;;  %v379_v40 = vadd.f32 %v378_v27, %v1599_v22 }
  0x4b   :  { %2672 = vst [vmem:[#allocation65_spill] sm:$0xff] %v1624_v55  ;;  %2673 = vst [vmem:[#allocation66_spill] sm:$0xff] %v1628_v34  ;;  %v441_v28 = vadd.f32 %v440_v35, %v1602_v54  ;;  %v1632_v49 = vld [vmem:[#allocation4 + $0x438] sm:$0xff]  ;;  %v625_v52 = vadd.f32 %v624_v21, %v1606_v62  ;;  %v1635_v11 = vld [vmem:[#allocation4 + $0x500] sm:$0xff]  ;;  %v214_v13 = vadd.f32 %v213_v1, %v199_v3 }
  0x4c   :  { %2674 = vst [vmem:[#allocation67_spill] sm:$0xff] %v1632_v49  ;;  %2675 = vst [vmem:[#allocation68_spill] sm:$0xff] %v1635_v11  ;;  %v1637_v7 = vld [vmem:[#allocation4 + $0x508] sm:$0xff]  ;;  %v503_v50 = vadd.f32 %v502_v19, %v1611_v20  ;;  %v564_v43 = vadd.f32 %v563_v25, %v1613_v42  ;;  %v1645_v27 = vld [vmem:[#allocation4 + $0x510] sm:$0xff]  ;;  %v202_v21 = vmul.f32 %v1369_v26, %v1369_v26 }
  0x4d   :  { %2676 = vst [vmem:[#allocation69_spill] sm:$0xff] %v1637_v7  ;;  %v1639_v48 = vld [vmem:[#allocation4 + $0x368] sm:$0xff]  ;;  %2678 = vst [vmem:[#allocation71_spill] sm:$0xff] %v1645_v27  ;;  %v687_v35 = vadd.f32 %v1637_v7, %v1635_v11  ;;  %v442_v62 = vadd.f32 %v441_v28, %v1622_v58  ;;  %v1652_v30 = vld [vmem:[#allocation4 + $0x3d8] sm:$0xff]  ;;  %v626_v1 = vadd.f32 %v625_v52, %v1628_v34 }
  0x4e   :  { %v1643_v61 = vld [vmem:[#allocation4 + $0x4a8] sm:$0xff]  ;;  %2679 = vst [vmem:[#allocation72_spill] sm:$0xff] %v1652_v30  ;;  %v1654_v3 = vld [vmem:[#allocation4 + $0x440] sm:$0xff]  ;;  %v1657_v19 = vld [vmem:[#allocation4 + $0x518] sm:$0xff]  ;;  %v203_v25 = vmul.f32 %v1382_v46, %v1382_v46  ;;  %v215_v42 = vadd.f32 %v214_v13, %v200_v0  ;;  %v254_v20 = vadd.f32 %v253_v9, %v190_v57  ;;  %v504_v7 = vadd.f32 %v503_v50, %v1624_v55 }
  0x4f   :  { %2677 = vst [vmem:[#allocation70_spill] sm:$0xff] %v1643_v61  ;;  %2680 = vst [vmem:[#allocation73_spill] sm:$0xff] %v1654_v3  ;;  %v1661_v54 = vld [vmem:[#allocation4 + $0x2f8] sm:$0xff]  ;;  %v565_v26 = vadd.f32 %v564_v43, %v1632_v49  ;;  %v1665_v28 = vld [vmem:[#allocation4 + $0x4b0] sm:$0xff]  ;;  %v688_v11 = vadd.f32 %v687_v35, %v1645_v27  ;;  %v317_v58 = vadd.f32 %v316_v18, %v1617_v38 }
  0x50   :  { %2681 = vst [vmem:[#allocation74_spill] sm:$0xff] %v1657_v19  ;;  %2682 = vst [vmem:[#allocation75_spill] sm:$0xff] %v1665_v28  ;;  %v380_v52 = vadd.f32 %v379_v40, %v1620_v41  ;;  %v1670_v34 = vld [vmem:[#allocation4 + $0x370] sm:$0xff]  ;;  %v1672_v22 = vld [vmem:[#allocation4 + $0x3e0] sm:$0xff]  ;;  %v627_v9 = vadd.f32 %v626_v1, %v1643_v61  ;;  %v216_v13 = vadd.f32 %v215_v42, %v201_v10 }
  0x51   :  { %v1674_v46 = vld [vmem:[#allocation4 + $0x448] sm:$0xff]  ;;  %v1677_v57 = vld [vmem:[#allocation4 + $0x520] sm:$0xff]  ;;  %v443_v0 = vadd.f32 %v442_v62, %v1639_v48  ;;  %v505_v50 = vadd.f32 %v504_v7, %v1652_v30  ;;  %v1681_v43 = vld [vmem:[#allocation4 + $0x450] sm:$0xff]  ;;  %v566_v18 = vadd.f32 %v565_v26, %v1654_v3  ;;  %v689_v35 = vadd.f32 %v688_v11, %v1657_v19 }
  0x52   :  { %2683 = vst [vmem:[#allocation76_spill] sm:$0xff] %v1674_v46  ;;  %2684 = vst [vmem:[#allocation77_spill] sm:$0xff] %v1677_v57  ;;  %v1684_v40 = vld [vmem:[#allocation4 + $0x4b8] sm:$0xff]  ;;  %v1687_v27 = vld [vmem:[#allocation4 + $0x580] sm:$0xff]  ;;  %v628_v49 = vadd.f32 %v627_v9, %v1665_v28  ;;  %v204_v62 = vmul.f32 %v1435_v2, %v1435_v2  ;;  %v205_v7 = vmul.f32 %v1471_v59, %v1471_v59 }
  0x53   :  { %2685 = vst [vmem:[#allocation78_spill] sm:$0xff] %v1681_v43  ;;  %2686 = vst [vmem:[#allocation79_spill] sm:$0xff] %v1684_v40  ;;  %v1690_v1 = vld [vmem:[#allocation4 + $0x528] sm:$0xff]  ;;  %v1694_v10 = vld [vmem:[#allocation4 + $0x590] sm:$0xff]  ;;  %v217_v42 = vadd.f32 %v216_v13, %v202_v21  ;;  %v506_v11 = vadd.f32 %v505_v50, %v1672_v22  ;;  %v567_v19 = vadd.f32 %v566_v18, %v1674_v46 }
  0x54   :  { %2687 = vst [vmem:[#allocation80_spill] sm:$0xff] %v1687_v27  ;;  %2688 = vst [vmem:[#allocation81_spill] sm:$0xff] %v1690_v1  ;;  %v1692_v61 = vld [vmem:[#allocation4 + $0x588] sm:$0xff]  ;;  %v1704_v9 = vld [vmem:[#allocation4 + $0x4c0] sm:$0xff]  ;;  %v690_v28 = vadd.f32 %v689_v35, %v1677_v57  ;;  %v318_v30 = vadd.f32 %v317_v58, %v254_v20  ;;  %v381_v2 = vadd.f32 %v380_v52, %v1661_v54 }
  0x55   :  { %2689 = vst [vmem:[#allocation82_spill] sm:$0xff] %v1692_v61  ;;  %2690 = vst [vmem:[#allocation83_spill] sm:$0xff] %v1694_v10  ;;  %v1700_v26 = vld [vmem:[#allocation4 + $0x3e8] sm:$0xff]  ;;  %v751_v3 = vadd.f32 %v1692_v61, %v1687_v27  ;;  %v1710_v55 = vld [vmem:[#allocation4 + $0x378] sm:$0xff]  ;;  %v629_v21 = vadd.f32 %v628_v49, %v1684_v40  ;;  %v218_v18 = vadd.f32 %v217_v42, %v203_v25 }
  0x56   :  { %2691 = vst [vmem:[#allocation84_spill] sm:$0xff] %v1700_v26  ;;  %2692 = vst [vmem:[#allocation85_spill] sm:$0xff] %v1704_v9  ;;  %v1712_v59 = vld [vmem:[#allocation4 + $0x458] sm:$0xff]  ;;  %v1715_v13 = vld [vmem:[#allocation4 + $0x530] sm:$0xff]  ;;  %v444_v46 = vadd.f32 %v443_v0, %v1670_v34  ;;  %v568_v20 = vadd.f32 %v567_v19, %v1681_v43  ;;  %v691_v52 = vadd.f32 %v690_v28, %v1690_v1 }
  0x57   :  { %2693 = vst [vmem:[#allocation86_spill] sm:$0xff] %v1712_v59  ;;  %2694 = vst [vmem:[#allocation87_spill] sm:$0xff] %v1715_v13  ;;  %v1717_v50 = vld [vmem:[#allocation4 + $0x598] sm:$0xff]  ;;  %v1720_v35 = vld [vmem:[#allocation4 + $0x3f0] sm:$0xff]  ;;  %v752_v61 = vadd.f32 %v751_v3, %v1694_v10  ;;  %v507_v49 = vadd.f32 %v506_v11, %v1700_v26  ;;  %v630_v25 = vadd.f32 %v629_v21, %v1704_v9 }
  0x58   :  { %2695 = vst [vmem:[#allocation88_spill] sm:$0xff] %v1717_v50  ;;  %v1722_v57 = vld [vmem:[#allocation4 + $0x460] sm:$0xff]  ;;  %v1725_v58 = vld [vmem:[#allocation4 + $0x4c8] sm:$0xff]  ;;  %v1730_v27 = vld [vmem:[#allocation4 + $0x4d0] sm:$0xff]  ;;  %v206_v40 = vmul.f32 %v1511_v53, %v1511_v53  ;;  %v219_v19 = vadd.f32 %v218_v18, %v204_v62  ;;  %v569_v43 = vadd.f32 %v568_v20, %v1712_v59  ;;  %v692_v28 = vadd.f32 %v691_v52, %v1715_v13 }
  0x59   :  { %2696 = vst [vmem:[#allocation89_spill] sm:$0xff] %v1722_v57  ;;  %2697 = vst [vmem:[#allocation90_spill] sm:$0xff] %v1725_v58  ;;  %v1733_v42 = vld [vmem:[#allocation4 + $0x538] sm:$0xff]  ;;  %v1735_v0 = vld [vmem:[#allocation4 + $0x5a0] sm:$0xff]  ;;  %v753_v3 = vadd.f32 %v752_v61, %v1717_v50  ;;  %v1750_v21 = vmul.f32 %v1257_v14, %v1257_v14  ;;  %v382_v9 = vadd.f32 %v381_v2, %v318_v30 }
  0x5a   :  { %2698 = vst [vmem:[#allocation91_spill] sm:$0xff] %v1730_v27  ;;  %2699 = vst [vmem:[#allocation92_spill] sm:$0xff] %v1733_v42  ;;  %v1742_v10 = vld [vmem:[#allocation4 + $0x600] sm:$0xff]  ;;  %v1744_v11 = vld [vmem:[#allocation4 + $0x608] sm:$0xff]  ;;  %v631_v53 = vadd.f32 %v630_v25, %v1725_v58  ;;  %v220_v20 = vadd.f32 %v219_v19, %v205_v7  ;;  %v445_v52 = vadd.f32 %v444_v46, %v1710_v55 }
  0x5b   :  { %2700 = vst [vmem:[#allocation93_spill] sm:$0xff] %v1735_v0  ;;  %2701 = vst [vmem:[#allocation94_spill] sm:$0xff] %v1742_v10  ;;  %v1746_v1 = vld [vmem:[#allocation4 + $0x610] sm:$0xff]  ;;  %v1752_v26 = vld [vmem:[#allocation4 + $0x468] sm:$0xff]  ;;  %v815_v61 = vadd.f32 %v1744_v11, %v1742_v10  ;;  %v570_v14 = vadd.f32 %v569_v43, %v1722_v57  ;;  %v693_v30 = vadd.f32 %v692_v28, %v1733_v42 }
  0x5c   :  { %2702 = vst [vmem:[#allocation95_spill] sm:$0xff] %v1744_v11  ;;  %2703 = vst [vmem:[#allocation96_spill] sm:$0xff] %v1746_v1  ;;  %v1755_v62 = vld [vmem:[#allocation4 + $0x540] sm:$0xff]  ;;  %v1757_v18 = vld [vmem:[#allocation4 + $0x5a8] sm:$0xff]  ;;  %v754_v2 = vadd.f32 %v753_v3, %v1735_v0  ;;  %v508_v58 = vadd.f32 %v507_v49, %v1720_v35  ;;  %v632_v7 = vadd.f32 %v631_v53, %v1730_v27 }
  0x5d   :  { %2704 = vst [vmem:[#allocation97_spill] sm:$0xff] %v1755_v62  ;;  %2705 = vst [vmem:[#allocation98_spill] sm:$0xff] %v1757_v18  ;;  %v1762_v50 = vld [vmem:[#allocation4 + $0x3f8] sm:$0xff]  ;;  %v1772_v59 = vld [vmem:[#allocation4 + $0x470] sm:$0xff]  ;;  %v816_v43 = vadd.f32 %v815_v61, %v1746_v1  ;;  %v221_v11 = vadd.f32 %v220_v20, %v206_v40  ;;  %v571_v10 = vadd.f32 %v570_v14, %v1752_v26 }
  0x5e   :  { %v1765_v13 = vld [vmem:[#allocation4 + $0x4d8] sm:$0xff]  ;;  %2708 = vst [vmem:[#allocation101_spill] sm:$0xff] %v1772_v59  ;;  %v1775_v19 = vld [vmem:[#allocation4 + $0x548] sm:$0xff]  ;;  %v1777_v46 = vld [vmem:[#allocation4 + $0x5b0] sm:$0xff]  ;;  %v694_v0 = vadd.f32 %v693_v30, %v1755_v62  ;;  %v755_v49 = vadd.f32 %v754_v2, %v1757_v18  ;;  %v256_v53 = vmul.f32 %v1259_v15, %v1259_v15  ;;  %v257_v30 = vmul.f32 %v1261_v16, %v1261_v16 }
  0x5f   :  { %2706 = vst [vmem:[#allocation99_spill] sm:$0xff] %v1765_v13  ;;  %v1769_v25 = vld [vmem:[#allocation4 + $0x618] sm:$0xff]  ;;  %2709 = vst [vmem:[#allocation102_spill] sm:$0xff] %v1775_v19  ;;  %v1781_v28 = vld [vmem:[#allocation4 + $0x4e0] sm:$0xff]  ;;  %v633_v27 = vadd.f32 %v632_v7, %v1765_v13  ;;  %v1800_v14 = vadd.f32 %v221_v11, %v1532_v33  ;;  %v446_v2 = vadd.f32 %v445_v52, %v382_v9 }
  0x60   :  { %2707 = vst [vmem:[#allocation100_spill] sm:$0xff] %v1769_v25  ;;  %2710 = vst [vmem:[#allocation103_spill] sm:$0xff] %v1777_v46  ;;  %v1783_v3 = vld [vmem:[#allocation4 + $0x550] sm:$0xff]  ;;  %v1787_v42 = vld [vmem:[#allocation4 + $0x620] sm:$0xff]  ;;  %v817_v40 = vadd.f32 %v816_v43, %v1769_v25  ;;  %v695_v7 = vadd.f32 %v694_v0, %v1775_v19  ;;  %v756_v18 = vadd.f32 %v755_v49, %v1777_v46 }
  0x61   :  { %2711 = vst [vmem:[#allocation104_spill] sm:$0xff] %v1781_v28  ;;  %2712 = vst [vmem:[#allocation105_spill] sm:$0xff] %v1783_v3  ;;  %v1792_v57 = vld [vmem:[#allocation4 + $0x5b8] sm:$0xff]  ;;  %v1795_v61 = vld [vmem:[#allocation4 + $0x680] sm:$0xff]  ;;  %v509_v11 = vadd.f32 %v508_v58, %v1762_v50  ;;  %v572_v16 = vadd.f32 %v571_v10, %v1772_v59  ;;  %v634_v9 = vadd.f32 %v633_v27, %v1781_v28 }
  0x62   :  { %2713 = vst [vmem:[#allocation106_spill] sm:$0xff] %v1787_v42  ;;  %2714 = vst [vmem:[#allocation107_spill] sm:$0xff] %v1792_v57  ;;  %v1797_v20 = vld [vmem:[#allocation4 + $0x688] sm:$0xff]  ;;  %v1804_v1 = vld [vmem:[#allocation4 + $0x478] sm:$0xff]  ;;  %v818_v0 = vadd.f32 %v817_v40, %v1787_v42  ;;  %v757_v58 = vadd.f32 %v756_v18, %v1792_v57  ;;  %v258_v59 = vmul.f32 %v1270_v32, %v1270_v32 }
  0x63   :  { %2715 = vst [vmem:[#allocation108_spill] sm:$0xff] %v1795_v61  ;;  %2716 = vst [vmem:[#allocation109_spill] sm:$0xff] %v1797_v20  ;;  %v1806_v15 = vld [vmem:[#allocation4 + $0x4e8] sm:$0xff]  ;;  %v1812_v25 = vld [vmem:[#allocation4 + $0x690] sm:$0xff]  ;;  %v879_v33 = vadd.f32 %v1797_v20, %v1795_v61  ;;  %v696_v20 = vadd.f32 %v695_v7, %v1783_v3  ;;  %v271_v7 = vadd.f32 %v256_v53, %v1750_v21 }
  0x64   :  { %2717 = vst [vmem:[#allocation110_spill] sm:$0xff] %v1806_v15  ;;  %v1810_v43 = vld [vmem:[#allocation4 + $0x628] sm:$0xff]  ;;  %2719 = vst [vmem:[#allocation112_spill] sm:$0xff] %v1812_v25  ;;  %v1819_v52 = vld [vmem:[#allocation4 + $0x558] sm:$0xff]  ;;  %v635_v10 = vadd.f32 %v634_v9, %v1806_v15  ;;  %v573_v32 = vadd.f32 %v572_v16, %v1804_v1 }
  0x65   :  { %2718 = vst [vmem:[#allocation111_spill] sm:$0xff] %v1810_v43  ;;  %2720 = vst [vmem:[#allocation113_spill] sm:$0xff] %v1819_v52  ;;  %v1821_v62 = vld [vmem:[#allocation4 + $0x5c0] sm:$0xff]  ;;  %v1824_v49 = vld [vmem:[#allocation4 + $0x698] sm:$0xff]  ;;  %v880_v27 = vadd.f32 %v879_v33, %v1812_v25  ;;  %v819_v40 = vadd.f32 %v818_v0, %v1810_v43  ;;  %v697_v18 = vadd.f32 %v696_v20, %v1819_v52 }
  0x66   :  { %2721 = vst [vmem:[#allocation114_spill] sm:$0xff] %v1821_v62  ;;  %2722 = vst [vmem:[#allocation115_spill] sm:$0xff] %v1824_v49  ;;  %v1826_v46 = vld [vmem:[#allocation4 + $0x4f0] sm:$0xff]  ;;  %v1828_v19 = vld [vmem:[#allocation4 + $0x560] sm:$0xff]  ;;  %v758_v33 = vadd.f32 %v757_v58, %v1821_v62  ;;  %v259_v0 = vmul.f32 %v1283_v56, %v1283_v56  ;;  %v510_v43 = vadd.f32 %v509_v11, %v446_v2 }
  0x67   :  { %v1832_v61 = vld [vmem:[#allocation4 + $0x630] sm:$0xff]  ;;  %v1836_v28 = vld [vmem:[#allocation4 + $0x568] sm:$0xff]  ;;  %v1841_v42 = vld [vmem:[#allocation4 + $0x6a0] sm:$0xff]  ;;  %v881_v25 = vadd.f32 %v880_v27, %v1824_v49  ;;  %v272_v58 = vadd.f32 %v271_v7, %v257_v30  ;;  %v698_v27 = vadd.f32 %v697_v18, %v1828_v19  ;;  %v636_v11 = vadd.f32 %v635_v10, %v1826_v46 }
  0x68   :  { %2723 = vst [vmem:[#allocation116_spill] sm:$0xff] %v1832_v61  ;;  %2724 = vst [vmem:[#allocation117_spill] sm:$0xff] %v1836_v28  ;;  %v1838_v13 = vld [vmem:[#allocation4 + $0x5c8] sm:$0xff]  ;;  %v1847_v57 = vld [vmem:[#allocation4 + $0x5d0] sm:$0xff]  ;;  %v820_v21 = vadd.f32 %v819_v40, %v1832_v61  ;;  %v260_v18 = vmul.f32 %v1304_v5, %v1304_v5 }
  0x69   :  { %2725 = vst [vmem:[#allocation118_spill] sm:$0xff] %v1838_v13  ;;  %2726 = vst [vmem:[#allocation119_spill] sm:$0xff] %v1841_v42  ;;  %v1850_v9 = vld [vmem:[#allocation4 + $0x638] sm:$0xff]  ;;  %v1853_v3 = vld [vmem:[#allocation4 + $0x700] sm:$0xff]  ;;  %v759_v49 = vadd.f32 %v758_v33, %v1838_v13  ;;  %v882_v56 = vadd.f32 %v881_v25, %v1841_v42  ;;  %v273_v33 = vadd.f32 %v272_v58, %v258_v59 }
  0x6a   :  { %2727 = vst [vmem:[#allocation120_spill] sm:$0xff] %v1847_v57  ;;  %2728 = vst [vmem:[#allocation121_spill] sm:$0xff] %v1850_v9  ;;  %v1859_v53 = vld [vmem:[#allocation4 + $0x6a8] sm:$0xff]  ;;  %v1863_v52 = vld [vmem:[#allocation4 + $0x710] sm:$0xff]  ;;  %v821_v40 = vadd.f32 %v820_v21, %v1850_v9  ;;  %v699_v25 = vadd.f32 %v698_v27, %v1836_v28  ;;  %v261_v58 = vmul.f32 %v1324_v29, %v1324_v29 }
  0x6b   :  { %2729 = vst [vmem:[#allocation122_spill] sm:$0xff] %v1853_v3  ;;  %2730 = vst [vmem:[#allocation123_spill] sm:$0xff] %v1859_v53  ;;  %v1861_v20 = vld [vmem:[#allocation4 + $0x708] sm:$0xff]  ;;  %v1865_v62 = vld [vmem:[#allocation4 + $0x4f8] sm:$0xff]  ;;  %v760_v10 = vadd.f32 %v759_v49, %v1847_v57  ;;  %v883_v21 = vadd.f32 %v882_v56, %v1859_v53  ;;  %v262_v49 = vmul.f32 %v1344_v31, %v1344_v31 }
  0x6c   :  { %2731 = vst [vmem:[#allocation124_spill] sm:$0xff] %v1861_v20  ;;  %2732 = vst [vmem:[#allocation125_spill] sm:$0xff] %v1863_v52  ;;  %v1869_v15 = vld [vmem:[#allocation4 + $0x640] sm:$0xff]  ;;  %v943_v2 = vadd.f32 %v1861_v20, %v1853_v3  ;;  %v1875_v16 = vld [vmem:[#allocation4 + $0x5d8] sm:$0xff]  ;;  %v274_v27 = vadd.f32 %v273_v33, %v259_v0  ;;  %v574_v57 = vadd.f32 %v573_v32, %v510_v43 }
  0x6d   :  { %2733 = vst [vmem:[#allocation126_spill] sm:$0xff] %v1869_v15  ;;  %2734 = vst [vmem:[#allocation127_spill] sm:$0xff] %v1875_v16  ;;  %v1878_v30 = vld [vmem:[#allocation4 + $0x6b0] sm:$0xff]  ;;  %v1880_v7 = vld [vmem:[#allocation4 + $0x718] sm:$0xff]  ;;  %v822_v13 = vadd.f32 %v821_v40, %v1869_v15  ;;  %v761_v56 = vadd.f32 %v760_v10, %v1875_v16  ;;  %v637_v28 = vadd.f32 %v636_v11, %v1865_v62 }
  0x6e   :  { %2735 = vst [vmem:[#allocation128_spill] sm:$0xff] %v1878_v30  ;;  %2736 = vst [vmem:[#allocation129_spill] sm:$0xff] %v1880_v7  ;;  %v1884_v61 = vld [vmem:[#allocation4 + $0x570] sm:$0xff]  ;;  %v1887_v42 = vld [vmem:[#allocation4 + $0x5e0] sm:$0xff]  ;;  %v944_v3 = vadd.f32 %v943_v2, %v1863_v52  ;;  %v884_v2 = vadd.f32 %v883_v21, %v1878_v30 }
  0x6f   :  { %v1890_v20 = vld [vmem:[#allocation4 + $0x648] sm:$0xff]  ;;  %v1894_v9 = vld [vmem:[#allocation4 + $0x650] sm:$0xff]  ;;  %v1897_v5 = vld [vmem:[#allocation4 + $0x6b8] sm:$0xff]  ;;  %v700_v33 = vadd.f32 %v699_v25, %v1884_v61  ;;  %v762_v10 = vadd.f32 %v761_v56, %v1887_v42  ;;  %v263_v25 = vmul.f32 %v1364_v51, %v1364_v51 }
  0x70   :  { %2737 = vst [vmem:[#allocation130_spill] sm:$0xff] %v1890_v20  ;;  %2738 = vst [vmem:[#allocation131_spill] sm:$0xff] %v1894_v9  ;;  %v1899_v59 = vld [vmem:[#allocation4 + $0x720] sm:$0xff]  ;;  %v945_v52 = vadd.f32 %v944_v3, %v1880_v7  ;;  %v1910_v40 = vld [vmem:[#allocation4 + $0x788] sm:$0xff]  ;;  %v823_v31 = vadd.f32 %v822_v13, %v1890_v20  ;;  %v275_v3 = vadd.f32 %v274_v27, %v260_v18 }
  0x71   :  { %2739 = vst [vmem:[#allocation132_spill] sm:$0xff] %v1897_v5  ;;  %2740 = vst [vmem:[#allocation133_spill] sm:$0xff] %v1899_v59  ;;  %v1908_v53 = vld [vmem:[#allocation4 + $0x780] sm:$0xff]  ;;  %v1912_v15 = vld [vmem:[#allocation4 + $0x790] sm:$0xff]  ;;  %v885_v11 = vadd.f32 %v884_v2, %v1897_v5  ;;  %v264_v5 = vmul.f32 %v1385_v45, %v1385_v45 }
  0x72   :  { %2741 = vst [vmem:[#allocation134_spill] sm:$0xff] %v1908_v53  ;;  %2742 = vst [vmem:[#allocation135_spill] sm:$0xff] %v1910_v40  ;;  %v1915_v29 = vld [vmem:[#allocation4 + $0x5e8] sm:$0xff]  ;;  %v1918_v0 = vld [vmem:[#allocation4 + $0x6c0] sm:$0xff]  ;;  %v1007_v32 = vadd.f32 %v1910_v40, %v1908_v53  ;;  %v946_v7 = vadd.f32 %v945_v52, %v1899_v59  ;;  %v824_v20 = vadd.f32 %v823_v31, %v1894_v9 }
  0x73   :  { %2743 = vst [vmem:[#allocation136_spill] sm:$0xff] %v1912_v15  ;;  %2744 = vst [vmem:[#allocation137_spill] sm:$0xff] %v1918_v0  ;;  %v1920_v43 = vld [vmem:[#allocation4 + $0x728] sm:$0xff]  ;;  %v1926_v21 = vld [vmem:[#allocation4 + $0x658] sm:$0xff]  ;;  %v276_v27 = vadd.f32 %v275_v3, %v261_v58  ;;  %v763_v52 = vadd.f32 %v762_v10, %v1915_v29  ;;  %v886_v53 = vadd.f32 %v885_v11, %v1918_v0 }
  0x74   :  { %2745 = vst [vmem:[#allocation138_spill] sm:$0xff] %v1920_v43  ;;  %2746 = vst [vmem:[#allocation139_spill] sm:$0xff] %v1926_v21  ;;  %v1930_v30 = vld [vmem:[#allocation4 + $0x798] sm:$0xff]  ;;  %v1935_v16 = vld [vmem:[#allocation4 + $0x6c8] sm:$0xff]  ;;  %v1008_v18 = vadd.f32 %v1007_v32, %v1912_v15  ;;  %v947_v31 = vadd.f32 %v946_v7, %v1920_v43  ;;  %v825_v32 = vadd.f32 %v824_v20, %v1926_v21 }
  0x75   :  { %2747 = vst [vmem:[#allocation140_spill] sm:$0xff] %v1930_v30  ;;  %v1932_v13 = vld [vmem:[#allocation4 + $0x578] sm:$0xff]  ;;  %v1937_v40 = vld [vmem:[#allocation4 + $0x730] sm:$0xff]  ;;  %v1945_v2 = vld [vmem:[#allocation4 + $0x660] sm:$0xff]  ;;  %v265_v3 = vmul.f32 %v1394_v36, %v1394_v36  ;;  %v277_v10 = vadd.f32 %v276_v27, %v262_v49  ;;  %v638_v11 = vadd.f32 %v637_v28, %v574_v57  ;;  %v887_v0 = vadd.f32 %v886_v53, %v1935_v16 }
  0x76   :  { %2748 = vst [vmem:[#allocation141_spill] sm:$0xff] %v1937_v40  ;;  %v1942_v56 = vld [vmem:[#allocation4 + $0x5f0] sm:$0xff]  ;;  %v1949_v59 = vld [vmem:[#allocation4 + $0x7a0] sm:$0xff]  ;;  %v1956_v51 = vld [vmem:[#allocation4 + $0x738] sm:$0xff]  ;;  %v1009_v58 = vadd.f32 %v1008_v18, %v1930_v30  ;;  %v701_v7 = vadd.f32 %v700_v33, %v1932_v13  ;;  %v948_v45 = vadd.f32 %v947_v31, %v1937_v40  ;;  %v826_v9 = vadd.f32 %v825_v32, %v1945_v2 }
  0x77   :  { %2749 = vst [vmem:[#allocation142_spill] sm:$0xff] %v1949_v59  ;;  %v1954_v15 = vld [vmem:[#allocation4 + $0x6d0] sm:$0xff]  ;;  %2751 = vst [vmem:[#allocation144_spill] sm:$0xff] %v1956_v51  ;;  %v1962_v43 = vld [vmem:[#allocation4 + $0x668] sm:$0xff]  ;;  %v764_v21 = vadd.f32 %v763_v52, %v1942_v56  ;;  %v278_v57 = vadd.f32 %v277_v10, %v263_v25  ;;  %v266_v52 = vmul.f32 %v1425_v47, %v1425_v47 }
  0x78   :  { %2750 = vst [vmem:[#allocation143_spill] sm:$0xff] %v1954_v15  ;;  %2752 = vst [vmem:[#allocation145_spill] sm:$0xff] %v1962_v43  ;;  %v1966_v20 = vld [vmem:[#allocation4 + $0x7a8] sm:$0xff]  ;;  %v1970_v18 = vld [vmem:[#allocation4 + $0x6d8] sm:$0xff]  ;;  %v1010_v36 = vadd.f32 %v1009_v58, %v1949_v59  ;;  %v888_v53 = vadd.f32 %v887_v0, %v1954_v15  ;;  %v949_v33 = vadd.f32 %v948_v45, %v1956_v51 }
  0x79   :  { %2753 = vst [vmem:[#allocation146_spill] sm:$0xff] %v1966_v20  ;;  %v1972_v30 = vld [vmem:[#allocation4 + $0x740] sm:$0xff]  ;;  %v1975_v28 = vld [vmem:[#allocation4 + $0x5f8] sm:$0xff]  ;;  %v1977_v49 = vld [vmem:[#allocation4 + $0x670] sm:$0xff]  ;;  %v267_v31 = vmul.f32 %v1449_v8, %v1449_v8  ;;  %v827_v32 = vadd.f32 %v826_v9, %v1962_v43  ;;  %v279_v59 = vadd.f32 %v278_v57, %v264_v5  ;;  %v319_v0 = vmul.f32 %v1291_v60, %v1291_v60 }
  0x7a   :  { %2754 = vst [vmem:[#allocation147_spill] sm:$0xff] %v1977_v49  ;;  %v1981_v27 = vld [vmem:[#allocation4 + $0x7b0] sm:$0xff]  ;;  %v1988_v58 = vld [vmem:[#allocation4 + $0x6e0] sm:$0xff]  ;;  %v1990_v25 = vld [vmem:[#allocation4 + $0x748] sm:$0xff]  ;;  %v1011_v10 = vadd.f32 %v1010_v36, %v1966_v20  ;;  %v702_v45 = vadd.f32 %v701_v7, %v638_v11  ;;  %v889_v51 = vadd.f32 %v888_v53, %v1970_v18  ;;  %v950_v47 = vadd.f32 %v949_v33, %v1972_v30 }
  0x7b   :  { %2755 = vst [vmem:[#allocation148_spill] sm:$0xff] %v1981_v27  ;;  %2756 = vst [vmem:[#allocation149_spill] sm:$0xff] %v1990_v25  ;;  %v1997_v40 = vld [vmem:[#allocation4 + $0x7b8] sm:$0xff]  ;;  %v320_v8 = vmul.f32 %v1293_v63, %v1293_v63  ;;  %v765_v9 = vadd.f32 %v764_v21, %v1975_v28  ;;  %v828_v43 = vadd.f32 %v827_v32, %v1977_v49  ;;  %v2003_v15 = vld [vmem:[#allocation4 + $0x6e8] sm:$0xff] }
  0x7c   :  { %2757 = vst [vmem:[#allocation150_spill] sm:$0xff] %v1997_v40  ;;  %v2005_v5 = vld [vmem:[#allocation4 + $0x750] sm:$0xff]  ;;  %v1012_v60 = vadd.f32 %v1011_v10, %v1981_v27  ;;  %v280_v11 = vadd.f32 %v279_v59, %v265_v3  ;;  %v2008_v7 = vld [vmem:[#allocation4 + $0x678] sm:$0xff]  ;;  %v890_v36 = vadd.f32 %v889_v51, %v1988_v58  ;;  %v951_v57 = vadd.f32 %v950_v47, %v1990_v25  ;;  %v2012_v53 = vld [vmem:[#allocation4 + $0x7c0] sm:$0xff] }
  0x7d   :  { %2758 = vst [vmem:[#allocation151_spill] sm:$0xff] %v2012_v53  ;;  %v321_v63 = vmul.f32 %v1306_v6, %v1306_v6  ;;  %v2016_v21 = vld [vmem:[#allocation4 + $0x6f0] sm:$0xff]  ;;  %v2018_v33 = vld [vmem:[#allocation4 + $0x758] sm:$0xff]  ;;  %v268_v59 = vmul.f32 %v1494_v24, %v1494_v24  ;;  %v269_v3 = vmul.f32 %v1535_v12, %v1535_v12  ;;  %v2027_v27 = vld [vmem:[#allocation4 + $0x7c8] sm:$0xff]  ;;  %v322_v6 = vmul.f32 %v1315_v17, %v1315_v17 }
  0x7e   :  { %v1013_v32 = vadd.f32 %v1012_v60, %v1997_v40  ;;  %v281_v51 = vadd.f32 %v280_v11, %v266_v52  ;;  %v891_v10 = vadd.f32 %v890_v36, %v2003_v15  ;;  %v952_v47 = vadd.f32 %v951_v57, %v2005_v5  ;;  %2759 = vst [vmem:[#allocation152_spill] sm:$0xff] %v2027_v27  ;;  %v2032_v40 = vld [vmem:[#allocation4 + $0x760] sm:$0xff]  ;;  %v2035_v12 = vld [vmem:[#allocation4 + $0x6f8] sm:$0xff]  ;;  %v2039_v36 = vld [vmem:[#allocation4 + $0x7d0] sm:$0xff] }
  0x7f   :  { %v335_v49 = vadd.f32 %v320_v8, %v319_v0  ;;  %v766_v20 = vadd.f32 %v765_v9, %v702_v45  ;;  %v829_v60 = vadd.f32 %v828_v43, %v2008_v7  ;;  %2760 = vst [vmem:[#allocation153_spill] sm:$0xff] %v2035_v12  ;;  %2761 = vst [vmem:[#allocation154_spill] sm:$0xff] %v2039_v36  ;;  %v2762_v57 = vld [vmem:[#allocation10_spill] sm:$0xff] }
  0x80   :  { %v1014_v24 = vadd.f32 %v1013_v32, %v2012_v53  ;;  %v282_v25 = vadd.f32 %v281_v51, %v267_v31  ;;  %v892_v52 = vadd.f32 %v891_v10, %v2016_v21  ;;  %v953_v11 = vadd.f32 %v952_v47, %v2018_v33  ;;  %v2043_v45 = vld [vmem:[#allocation4 + $0x768] sm:$0xff]  ;;  %v2049_v32 = vld [vmem:[#allocation4 + $0x7d8] sm:$0xff] }
  0x81   :  { %v323_v17 = vmul.f32 %v2762_v57, %v2762_v57  ;;  %v336_v0 = vadd.f32 %v335_v49, %v321_v63  ;;  %v270_v8 = vmul.f32 %v1566_v23, %v1566_v23  ;;  %2763 = vst [vmem:[#allocation10_spill] sm:$0xff] %v2049_v32  ;;  %v2764_v51 = vld [vmem:[#allocation12_spill] sm:$0xff]  ;;  %v830_v53 = vadd.f32 %v829_v60, %v766_v20  ;;  %v2054_v49 = vld [vmem:[#allocation4 + $0x770] sm:$0xff]  ;;  %v2058_v23 = vld [vmem:[#allocation4 + $0x7e0] sm:$0xff] }
  0x82   :  { %v1015_v43 = vadd.f32 %v1014_v24, %v2027_v27  ;;  %v283_v31 = vadd.f32 %v282_v25, %v268_v59  ;;  %v954_v9 = vadd.f32 %v953_v11, %v2032_v40  ;;  %v324_v10 = vmul.f32 %v2764_v51, %v2764_v51  ;;  %2765 = vst [vmem:[#allocation12_spill] sm:$0xff] %v2054_v49  ;;  %v2062_v11 = vld [vmem:[#allocation4 + $0x778] sm:$0xff]  ;;  %v2768_v60 = vld [vmem:[#allocation11_spill] sm:$0xff] }
  0x83   :  { %v337_v47 = vadd.f32 %v336_v0, %v322_v6  ;;  %v893_v57 = vadd.f32 %v892_v52, %v2035_v12  ;;  %2766 = vst [vmem:[#allocation155_spill] sm:$0xff] %v2058_v23  ;;  %v325_v25 = vmul.f32 %v1372_v44, %v1372_v44  ;;  %2767 = vst [vmem:[#allocation156_spill] sm:$0xff] %v2062_v11  ;;  %v2769_v0 = vld [vmem:[#allocation13_spill] sm:$0xff] }
  0x84   :  { %v1016_v63 = vadd.f32 %v1015_v43, %v2039_v36  ;;  %v284_v24 = vadd.f32 %v283_v31, %v269_v3  ;;  %v955_v27 = vadd.f32 %v954_v9, %v2043_v45  ;;  %v383_v52 = vmul.f32 %v2768_v60, %v2768_v60  ;;  %v2070_v31 = vld [vmem:[#allocation4 + $0x7e8] sm:$0xff]  ;;  %v2771_v9 = vld [vmem:[#allocation16_spill] sm:$0xff]  ;;  %v2802_v12 = vld [vmem:[#allocation37_spill] sm:$0xff] }
  0x85   :  { %v338_v59 = vadd.f32 %v337_v47, %v323_v17  ;;  %v384_v43 = vmul.f32 %v2769_v0, %v2769_v0  ;;  %2770 = vst [vmem:[#allocation11_spill] sm:$0xff] %v2070_v31  ;;  %v326_v51 = vmul.f32 %v2771_v9, %v2771_v9  ;;  %v894_v17 = vadd.f32 %v893_v57, %v830_v53  ;;  %v2081_v0 = vld [vmem:[#allocation4 + $0x7f0] sm:$0xff] }
  0x86   :  { %v1017_v6 = vadd.f32 %v1016_v63, %v2049_v32  ;;  %v285_v20 = vadd.f32 %v284_v24, %v270_v8  ;;  %v956_v3 = vadd.f32 %v955_v27, %v2054_v49  ;;  %v2772_v8 = vld [vmem:[#allocation14_spill] sm:$0xff]  ;;  %2773 = vst [vmem:[#allocation13_spill] sm:$0xff] %v2081_v0  ;;  %v2774_v27 = vld [vmem:[#allocation21_spill] sm:$0xff]  ;;  %v2801_v49 = vld [vmem:[#allocation39_spill] sm:$0xff] }
  0x87   :  { %v339_v44 = vadd.f32 %v338_v59, %v324_v10  ;;  %v385_v24 = vmul.f32 %v2772_v8, %v2772_v8  ;;  %v327_v32 = vmul.f32 %v2774_v27, %v2774_v27  ;;  %v2775_v10 = vld [vmem:[#allocation15_spill] sm:$0xff]  ;;  %v399_v57 = vadd.f32 %v384_v43, %v383_v52  ;;  %v2088_v59 = vld [vmem:[#allocation4 + $0x7f8] sm:$0xff] }
  0x88   :  { %v1018_v47 = vadd.f32 %v1017_v6, %v2058_v23  ;;  %v2076_v63 = vadd.f32 %v285_v20, %v1800_v14  ;;  %v957_v60 = vadd.f32 %v956_v3, %v2062_v11  ;;  %v386_v53 = vmul.f32 %v2775_v10, %v2775_v10  ;;  %2776 = vst [vmem:[#allocation16_spill] sm:$0xff] %v2088_v59  ;;  %v2777_v14 = vld [vmem:[#allocation24_spill] sm:$0xff]  ;;  %v2778_v23 = vld [vmem:[#allocation17_spill] sm:$0xff]  ;;  %v2780_v43 = vld [vmem:[#allocation19_spill] sm:$0xff] }
  0x89   :  { %v340_v36 = vadd.f32 %v339_v44, %v325_v25  ;;  %v328_v6 = vmul.f32 %v2777_v14, %v2777_v14  ;;  %v387_v11 = vmul.f32 %v2778_v23, %v2778_v23  ;;  %v400_v27 = vadd.f32 %v399_v57, %v385_v24 }
  0x8a   :  { %v1019_v9 = vadd.f32 %v1018_v47, %v2070_v31  ;;  %v958_v8 = vadd.f32 %v957_v60, %v894_v17  ;;  %v329_v25 = vmul.f32 %v1451_v4, %v1451_v4  ;;  %v2779_v47 = vld [vmem:[#allocation18_spill] sm:$0xff]  ;;  %v448_v10 = vmul.f32 %v2780_v43, %v2780_v43  ;;  %v2782_v60 = vld [vmem:[#allocation20_spill] sm:$0xff] }
  0x8b   :  { %v341_v20 = vadd.f32 %v340_v36, %v326_v51  ;;  %v447_v52 = vmul.f32 %v2779_v47, %v2779_v47  ;;  %v2781_v36 = vld [vmem:[#allocation22_spill] sm:$0xff]  ;;  %v401_v17 = vadd.f32 %v400_v27, %v386_v53  ;;  %v330_v23 = vmul.f32 %v1483_v39, %v1483_v39  ;;  %v2785_v53 = vld [vmem:[#allocation23_spill] sm:$0xff] }
  0x8c   :  { %v1020_v3 = vadd.f32 %v1019_v9, %v2081_v0  ;;  %v388_v51 = vmul.f32 %v2781_v36, %v2781_v36  ;;  %v449_v4 = vmul.f32 %v2782_v60, %v2782_v60  ;;  %v2783_v9 = vld [vmem:[#allocation35_spill] sm:$0xff]  ;;  %v450_v27 = vmul.f32 %v2785_v53, %v2785_v53  ;;  %v2792_v53 = vld [vmem:[#allocation36_spill] sm:$0xff] }
  0x8d   :  { %v342_v44 = vadd.f32 %v341_v20, %v327_v32  ;;  %v331_v57 = vmul.f32 %v2783_v9, %v2783_v9  ;;  %v2784_v20 = vld [vmem:[#allocation25_spill] sm:$0xff]  ;;  %v402_v43 = vadd.f32 %v401_v17, %v387_v11  ;;  %v463_v39 = vadd.f32 %v448_v10, %v447_v52  ;;  %v2788_v9 = vld [vmem:[#allocation26_spill] sm:$0xff]  ;;  %v2791_v10 = vld [vmem:[#allocation32_spill] sm:$0xff] }
  0x8e   :  { %v1021_v14 = vadd.f32 %v1020_v3, %v2088_v59  ;;  %v389_v47 = vmul.f32 %v2784_v20, %v2784_v20  ;;  %v332_v3 = vmul.f32 %v1537_v37, %v1537_v37  ;;  %v451_v20 = vmul.f32 %v2788_v9, %v2788_v9  ;;  %v2789_v59 = vld [vmem:[#allocation28_spill] sm:$0xff] }
  0x8f   :  { %v343_v24 = vadd.f32 %v342_v44, %v328_v6  ;;  %v2786_v6 = vld [vmem:[#allocation56_spill] sm:$0xff]  ;;  %v403_v60 = vadd.f32 %v402_v43, %v388_v51  ;;  %v464_v17 = vadd.f32 %v463_v39, %v449_v4  ;;  %v511_v37 = vmul.f32 %v2789_v59, %v2789_v59  ;;  %v2795_v39 = vld [vmem:[#allocation38_spill] sm:$0xff] }
  0x90   :  { %v1022_v32 = vadd.f32 %v1021_v14, %v958_v8  ;;  %v333_v44 = vmul.f32 %v2786_v6, %v2786_v6  ;;  %v2787_v8 = vld [vmem:[#allocation27_spill] sm:$0xff]  ;;  %v334_v52 = vmul.f32 %v1617_v38, %v1617_v38  ;;  %v392_v51 = vmul.f32 %v2792_v53, %v2792_v53 }
  0x91   :  { %v344_v36 = vadd.f32 %v343_v24, %v329_v25  ;;  %v390_v14 = vmul.f32 %v2787_v8, %v2787_v8  ;;  %v2790_v25 = vld [vmem:[#allocation29_spill] sm:$0xff]  ;;  %v404_v43 = vadd.f32 %v403_v60, %v389_v47  ;;  %v2793_v8 = vld [vmem:[#allocation30_spill] sm:$0xff]  ;;  %v465_v4 = vadd.f32 %v464_v17, %v450_v27  ;;  %v2799_v27 = vld [vmem:[#allocation48_spill] sm:$0xff] }
  0x92   :  { %1061 = vadd.xlane.f32.xlu0 %v1022_v32  ;;  %v512_v24 = vmul.f32 %v2790_v25, %v2790_v25  ;;  %v391_v32 = vmul.f32 %v2791_v10, %v2791_v10  ;;  %v393_v9 = vmul.f32 %v2795_v39, %v2795_v39  ;;  %v2796_v25 = vld [vmem:[#allocation45_spill] sm:$0xff]  ;;  %v2797_v10 = vld [vmem:[#allocation34_spill] sm:$0xff]  ;;  %v395_v17 = vmul.f32 %v2799_v27, %v2799_v27 }
  0x93   :  { %v345_v11 = vadd.f32 %v344_v36, %v330_v23  ;;  %v452_v23 = vmul.f32 %v2793_v8, %v2793_v8  ;;  %v2794_v36 = vld [vmem:[#allocation31_spill] sm:$0xff]  ;;  %v394_v38 = vmul.f32 %v2796_v25, %v2796_v25  ;;  %v405_v0 = vadd.f32 %v404_v43, %v390_v14 }
  0x94   :  { %v513_v59 = vmul.f32 %v2794_v36, %v2794_v36  ;;  %v453_v31 = vmul.f32 %v2797_v10, %v2797_v10  ;;  %v466_v47 = vadd.f32 %v465_v4, %v451_v20  ;;  %v2800_v8 = vld [vmem:[#allocation59_spill] sm:$0xff]  ;;  %v454_v25 = vmul.f32 %v2801_v49, %v2801_v49  ;;  %v2803_v4 = vld [vmem:[#allocation44_spill] sm:$0xff]  ;;  %v2806_v49 = vld [vmem:[#allocation42_spill] sm:$0xff] }
  0x95   :  { %v346_v6 = vadd.f32 %v345_v11, %v331_v57  ;;  %v2798_v57 = vld [vmem:[#allocation33_spill] sm:$0xff]  ;;  %v527_v11 = vadd.f32 %v512_v24, %v511_v37  ;;  %v396_v36 = vmul.f32 %v2800_v8, %v2800_v8  ;;  %v406_v39 = vadd.f32 %v405_v0, %v391_v32 }
  0x96   :  { %v514_v60 = vmul.f32 %v2798_v57, %v2798_v57  ;;  %v467_v43 = vadd.f32 %v466_v47, %v452_v23  ;;  %v455_v37 = vmul.f32 %v2803_v4, %v2803_v4  ;;  %v2804_v24 = vld [vmem:[#allocation41_spill] sm:$0xff]  ;;  %v2805_v57 = vld [vmem:[#allocation40_spill] sm:$0xff] }
  0x97   :  { %v347_v53 = vadd.f32 %v346_v6, %v332_v3  ;;  %v515_v3 = vmul.f32 %v2802_v12, %v2802_v12  ;;  %v528_v20 = vadd.f32 %v527_v11, %v513_v59  ;;  %v407_v6 = vadd.f32 %v406_v39, %v392_v51  ;;  %v2807_v51 = vld [vmem:[#allocation49_spill] sm:$0xff] }
  0x98   :  { %v516_v10 = vmul.f32 %v2804_v24, %v2804_v24  ;;  %v575_v27 = vmul.f32 %v2805_v57, %v2805_v57  ;;  %v468_v32 = vadd.f32 %v467_v43, %v453_v31  ;;  %v397_v12 = vmul.f32 %v1620_v41, %v1620_v41  ;;  %v2810_v43 = vld [vmem:[#allocation50_spill] sm:$0xff]  ;;  %v2812_v57 = vld [vmem:[#allocation47_spill] sm:$0xff] }
  0x99   :  { %v348_v14 = vadd.f32 %v347_v53, %v333_v44  ;;  %v529_v8 = vadd.f32 %v528_v20, %v514_v60  ;;  %v576_v44 = vmul.f32 %v2806_v49, %v2806_v49  ;;  %v408_v23 = vadd.f32 %v407_v6, %v393_v9  ;;  %v2808_v53 = vld [vmem:[#allocation46_spill] sm:$0xff]  ;;  %v2811_v9 = vld [vmem:[#allocation51_spill] sm:$0xff] }
  0x9a   :  { %v456_v59 = vmul.f32 %v2807_v51, %v2807_v51  ;;  %v517_v47 = vmul.f32 %v2808_v53, %v2808_v53  ;;  %v469_v39 = vadd.f32 %v468_v32, %v454_v25  ;;  %v398_v60 = vmul.f32 %v1661_v54, %v1661_v54  ;;  %v2816_v53 = vld [vmem:[#allocation52_spill] sm:$0xff] }
  0x9b   :  { %v349_v0 = vadd.f32 %v348_v14, %v334_v52  ;;  %v530_v4 = vadd.f32 %v529_v8, %v515_v3  ;;  %v2809_v52 = vld [vmem:[#allocation43_spill] sm:$0xff]  ;;  %v409_v14 = vadd.f32 %v408_v23, %v394_v38  ;;  %v457_v41 = vmul.f32 %v2810_v43, %v2810_v43  ;;  %v2814_v8 = vld [vmem:[#allocation64_spill] sm:$0xff]  ;;  %v2815_v38 = vld [vmem:[#allocation57_spill] sm:$0xff] }
  0x9c   :  { %v577_v31 = vmul.f32 %v2809_v52, %v2809_v52  ;;  %v518_v20 = vmul.f32 %v2811_v9, %v2811_v9  ;;  %v470_v6 = vadd.f32 %v469_v39, %v455_v37  ;;  %v591_v25 = vadd.f32 %v576_v44, %v575_v27  ;;  %v2817_v44 = vld [vmem:[#allocation62_spill] sm:$0xff] }
  0x9d   :  { %v350_v11 = vadd.f32 %v349_v0, %v2076_v63  ;;  %v531_v24 = vadd.f32 %v530_v4, %v516_v10  ;;  %v578_v63 = vmul.f32 %v2812_v57, %v2812_v57  ;;  %v410_v3 = vadd.f32 %v409_v14, %v395_v17  ;;  %v2813_v0 = vld [vmem:[#allocation60_spill] sm:$0xff]  ;;  %v2818_v43 = vld [vmem:[#allocation58_spill] sm:$0xff] }
  0x9e   :  { %v458_v32 = vmul.f32 %v2813_v0, %v2813_v0  ;;  %v459_v54 = vmul.f32 %v2814_v8, %v2814_v8  ;;  %v519_v49 = vmul.f32 %v2815_v38, %v2815_v38  ;;  %v471_v23 = vadd.f32 %v470_v6, %v456_v59  ;;  %v2819_v6 = vld [vmem:[#allocation65_spill] sm:$0xff]  ;;  %v2824_v38 = vld [vmem:[#allocation55_spill] sm:$0xff] }
  0x9f   :  { %v532_v51 = vadd.f32 %v531_v24, %v517_v47  ;;  %v579_v37 = vmul.f32 %v2816_v53, %v2816_v53  ;;  %v592_v10 = vadd.f32 %v591_v25, %v577_v31  ;;  %v411_v39 = vadd.f32 %v410_v3, %v396_v36  ;;  %v2820_v36 = vld [vmem:[#allocation53_spill] sm:$0xff]  ;;  %v2822_v3 = vld [vmem:[#allocation63_spill] sm:$0xff] }
  0xa0   :  { %v460_v27 = vmul.f32 %v1639_v48, %v1639_v48  ;;  %v461_v17 = vmul.f32 %v1670_v34, %v1670_v34  ;;  %v520_v4 = vmul.f32 %v2817_v44, %v2817_v44  ;;  %v472_v52 = vadd.f32 %v471_v23, %v457_v41  ;;  %v2821_v48 = vld [vmem:[#allocation54_spill] sm:$0xff] }
  0xa1   :  { %v533_v14 = vadd.f32 %v532_v51, %v518_v20  ;;  %v580_v59 = vmul.f32 %v2818_v43, %v2818_v43  ;;  %v593_v47 = vadd.f32 %v592_v10, %v578_v63  ;;  %v412_v9 = vadd.f32 %v411_v39, %v397_v12  ;;  %v2823_v12 = vld [vmem:[#allocation72_spill] sm:$0xff]  ;;  %v2825_v10 = vld [vmem:[#allocation67_spill] sm:$0xff]  ;;  %v2827_v43 = vld [vmem:[#allocation73_spill] sm:$0xff] }
  0xa2   :  { %v521_v31 = vmul.f32 %v2819_v6, %v2819_v6  ;;  %v639_v24 = vmul.f32 %v2820_v36, %v2820_v36  ;;  %v640_v57 = vmul.f32 %v2821_v48, %v2821_v48  ;;  %v473_v34 = vadd.f32 %v472_v52, %v458_v32 }
  0xa3   :  { %v534_v25 = vadd.f32 %v533_v14, %v519_v49  ;;  %v581_v41 = vmul.f32 %v2822_v3, %v2822_v3  ;;  %v594_v20 = vadd.f32 %v593_v47, %v579_v37  ;;  %v413_v0 = vadd.f32 %v412_v9, %v398_v60  ;;  %v2826_v60 = vld [vmem:[#allocation61_spill] sm:$0xff]  ;;  %v2832_v3 = vld [vmem:[#allocation68_spill] sm:$0xff] }
  0xa4   :  { %v462_v63 = vmul.f32 %v1710_v55, %v1710_v55  ;;  %v522_v8 = vmul.f32 %v2823_v12, %v2823_v12  ;;  %v641_v23 = vmul.f32 %v2824_v38, %v2824_v38  ;;  %v474_v51 = vadd.f32 %v473_v34, %v459_v54  ;;  %v2828_v54 = vld [vmem:[#allocation84_spill] sm:$0xff]  ;;  %v2834_v38 = vld [vmem:[#allocation78_spill] sm:$0xff] }
  0xa5   :  { %v535_v53 = vadd.f32 %v534_v25, %v520_v4  ;;  %v582_v32 = vmul.f32 %v2825_v10, %v2825_v10  ;;  %v595_v49 = vadd.f32 %v594_v20, %v580_v59  ;;  %v414_v39 = vadd.f32 %v413_v0, %v350_v11  ;;  %v2829_v11 = vld [vmem:[#allocation66_spill] sm:$0xff]  ;;  %v2830_v34 = vld [vmem:[#allocation76_spill] sm:$0xff]  ;;  %v2833_v20 = vld [vmem:[#allocation69_spill] sm:$0xff] }
  0xa6   :  { %v523_v37 = vmul.f32 %v1672_v22, %v1672_v22  ;;  %v642_v44 = vmul.f32 %v2826_v60, %v2826_v60  ;;  %v655_v55 = vadd.f32 %v640_v57, %v639_v24  ;;  %v475_v52 = vadd.f32 %v474_v51, %v460_v27  ;;  %v2831_v24 = vld [vmem:[#allocation70_spill] sm:$0xff]  ;;  %v2835_v51 = vld [vmem:[#allocation75_spill] sm:$0xff] }
  0xa7   :  { %v536_v14 = vadd.f32 %v535_v53, %v521_v31  ;;  %v583_v47 = vmul.f32 %v2827_v43, %v2827_v43  ;;  %v596_v9 = vadd.f32 %v595_v49, %v581_v41  ;;  %v524_v4 = vmul.f32 %v2828_v54, %v2828_v54 }
  0xa8   :  { %v525_v59 = vmul.f32 %v1720_v35, %v1720_v35  ;;  %v643_v6 = vmul.f32 %v2829_v11, %v2829_v11  ;;  %v656_v22 = vadd.f32 %v655_v55, %v641_v23  ;;  %v476_v36 = vadd.f32 %v475_v52, %v461_v17  ;;  %v2837_v55 = vld [vmem:[#allocation86_spill] sm:$0xff]  ;;  %v2838_v52 = vld [vmem:[#allocation79_spill] sm:$0xff]  ;;  %v2840_v11 = vld [vmem:[#allocation89_spill] sm:$0xff] }
  0xa9   :  { %v537_v48 = vadd.f32 %v536_v14, %v522_v8  ;;  %v584_v27 = vmul.f32 %v2830_v34, %v2830_v34  ;;  %v597_v31 = vadd.f32 %v596_v9, %v582_v32  ;;  %v644_v57 = vmul.f32 %v2831_v24, %v2831_v24  ;;  %v2836_v32 = vld [vmem:[#allocation71_spill] sm:$0xff]  ;;  %v2842_v34 = vld [vmem:[#allocation77_spill] sm:$0xff] }
  0xaa   :  { %v657_v25 = vadd.f32 %v656_v22, %v642_v44  ;;  %v703_v41 = vmul.f32 %v2832_v3, %v2832_v3  ;;  %v704_v35 = vmul.f32 %v2833_v20, %v2833_v20  ;;  %v477_v0 = vadd.f32 %v476_v36, %v462_v63  ;;  %v2841_v22 = vld [vmem:[#allocation85_spill] sm:$0xff] }
  0xab   :  { %v538_v12 = vadd.f32 %v537_v48, %v523_v37  ;;  %v585_v17 = vmul.f32 %v2834_v38, %v2834_v38  ;;  %v598_v8 = vadd.f32 %v597_v31, %v583_v47  ;;  %v526_v23 = vmul.f32 %v1762_v50, %v1762_v50  ;;  %v2839_v47 = vld [vmem:[#allocation74_spill] sm:$0xff]  ;;  %v2844_v3 = vld [vmem:[#allocation81_spill] sm:$0xff] }
  0xac   :  { %v645_v53 = vmul.f32 %v2835_v51, %v2835_v51  ;;  %v658_v10 = vadd.f32 %v657_v25, %v643_v6  ;;  %v705_v49 = vmul.f32 %v2836_v32, %v2836_v32  ;;  %v478_v60 = vadd.f32 %v477_v0, %v414_v39  ;;  %v2843_v25 = vld [vmem:[#allocation90_spill] sm:$0xff] }
  0xad   :  { %v539_v44 = vadd.f32 %v538_v12, %v524_v4  ;;  %v586_v63 = vmul.f32 %v2837_v55, %v2837_v55  ;;  %v599_v37 = vadd.f32 %v598_v8, %v584_v27  ;;  %v646_v14 = vmul.f32 %v2838_v52, %v2838_v52  ;;  %v2846_v12 = vld [vmem:[#allocation82_spill] sm:$0xff]  ;;  %v2847_v8 = vld [vmem:[#allocation101_spill] sm:$0xff] }
  0xae   :  { %v659_v43 = vadd.f32 %v658_v10, %v644_v57  ;;  %v706_v50 = vmul.f32 %v2839_v47, %v2839_v47  ;;  %v719_v9 = vadd.f32 %v704_v35, %v703_v41  ;;  %v587_v6 = vmul.f32 %v2840_v11, %v2840_v11  ;;  %v2852_v47 = vld [vmem:[#allocation92_spill] sm:$0xff] }
  0xaf   :  { %v540_v54 = vadd.f32 %v539_v44, %v525_v59  ;;  %v588_v39 = vmul.f32 %v1752_v26, %v1752_v26  ;;  %v600_v4 = vadd.f32 %v599_v37, %v585_v17  ;;  %v647_v36 = vmul.f32 %v2841_v22, %v2841_v22  ;;  %v2845_v26 = vld [vmem:[#allocation80_spill] sm:$0xff] }
  0xb0   :  { %v660_v48 = vadd.f32 %v659_v43, %v645_v53  ;;  %v707_v27 = vmul.f32 %v2842_v34, %v2842_v34  ;;  %v720_v31 = vadd.f32 %v719_v9, %v705_v49  ;;  %v648_v59 = vmul.f32 %v2843_v25, %v2843_v25  ;;  %v2848_v53 = vld [vmem:[#allocation91_spill] sm:$0xff]  ;;  %v2853_v11 = vld [vmem:[#allocation88_spill] sm:$0xff]  ;;  %v2855_v34 = vld [vmem:[#allocation110_spill] sm:$0xff] }
  0xb1   :  { %v541_v24 = vadd.f32 %v540_v54, %v526_v23  ;;  %v601_v57 = vadd.f32 %v600_v4, %v586_v63  ;;  %v708_v41 = vmul.f32 %v2844_v3, %v2844_v3  ;;  %v767_v0 = vmul.f32 %v2845_v26, %v2845_v26  ;;  %v2849_v49 = vld [vmem:[#allocation87_spill] sm:$0xff] }
  0xb2   :  { %v661_v20 = vadd.f32 %v660_v48, %v646_v14  ;;  %v721_v35 = vadd.f32 %v720_v31, %v706_v50  ;;  %v768_v38 = vmul.f32 %v2846_v12, %v2846_v12  ;;  %v589_v51 = vmul.f32 %v2847_v8, %v2847_v8  ;;  %v2850_v63 = vld [vmem:[#allocation83_spill] sm:$0xff] }
  0xb3   :  { %v542_v17 = vadd.f32 %v541_v24, %v478_v60  ;;  %v602_v23 = vadd.f32 %v601_v57, %v587_v6  ;;  %v649_v10 = vmul.f32 %v2848_v53, %v2848_v53  ;;  %v709_v44 = vmul.f32 %v2849_v49, %v2849_v49  ;;  %v2851_v60 = vld [vmem:[#allocation99_spill] sm:$0xff]  ;;  %v2857_v57 = vld [vmem:[#allocation93_spill] sm:$0xff] }
  0xb4   :  { %v662_v32 = vadd.f32 %v661_v20, %v647_v36  ;;  %v722_v55 = vadd.f32 %v721_v35, %v707_v27  ;;  %v769_v37 = vmul.f32 %v2850_v63, %v2850_v63  ;;  %v590_v52 = vmul.f32 %v1804_v1, %v1804_v1  ;;  %v2854_v36 = vld [vmem:[#allocation104_spill] sm:$0xff]  ;;  %v2859_v35 = vld [vmem:[#allocation94_spill] sm:$0xff]  ;;  %v2862_v49 = vld [vmem:[#allocation105_spill] sm:$0xff] }
  0xb5   :  { %v603_v14 = vadd.f32 %v602_v23, %v588_v39  ;;  %v650_v43 = vmul.f32 %v2851_v60, %v2851_v60  ;;  %v710_v50 = vmul.f32 %v2852_v47, %v2852_v47  ;;  %v770_v6 = vmul.f32 %v2853_v11, %v2853_v11  ;;  %v2856_v39 = vld [vmem:[#allocation97_spill] sm:$0xff] }
  0xb6   :  { %v663_v9 = vadd.f32 %v662_v32, %v648_v59  ;;  %v723_v54 = vadd.f32 %v722_v55, %v708_v41  ;;  %v783_v4 = vadd.f32 %v768_v38, %v767_v0  ;;  %v651_v48 = vmul.f32 %v2854_v36, %v2854_v36  ;;  %v2858_v41 = vld [vmem:[#allocation102_spill] sm:$0xff]  ;;  %v2860_v0 = vld [vmem:[#allocation95_spill] sm:$0xff]  ;;  %v2863_v55 = vld [vmem:[#allocation96_spill] sm:$0xff] }
  0xb7   :  { %v604_v22 = vadd.f32 %v603_v14, %v589_v51  ;;  %v652_v1 = vmul.f32 %v2855_v34, %v2855_v34  ;;  %v711_v27 = vmul.f32 %v2856_v39, %v2856_v39  ;;  %v771_v25 = vmul.f32 %v2857_v57, %v2857_v57  ;;  %v2861_v51 = vld [vmem:[#allocation98_spill] sm:$0xff]  ;;  %v2864_v14 = vld [vmem:[#allocation103_spill] sm:$0xff]  ;;  %v2868_v34 = vld [vmem:[#allocation117_spill] sm:$0xff] }
  0xb8   :  { %v664_v31 = vadd.f32 %v663_v9, %v649_v10  ;;  %v724_v24 = vadd.f32 %v723_v54, %v709_v44  ;;  %v784_v59 = vadd.f32 %v783_v4, %v769_v37  ;;  %v712_v20 = vmul.f32 %v2858_v41, %v2858_v41  ;;  %v2866_v9 = vld [vmem:[#allocation100_spill] sm:$0xff]  ;;  %v2867_v4 = vld [vmem:[#allocation107_spill] sm:$0xff] }
  0xb9   :  { %v605_v3 = vadd.f32 %v604_v22, %v590_v52  ;;  %v831_v26 = vmul.f32 %v2859_v35, %v2859_v35  ;;  %v832_v12 = vmul.f32 %v2860_v0, %v2860_v0  ;;  %v772_v23 = vmul.f32 %v2861_v51, %v2861_v51  ;;  %v2874_v51 = vld [vmem:[#allocation109_spill] sm:$0xff] }
  0xba   :  { %v665_v38 = vadd.f32 %v664_v31, %v650_v43  ;;  %v725_v8 = vadd.f32 %v724_v24, %v710_v50  ;;  %v785_v53 = vadd.f32 %v784_v59, %v770_v6  ;;  %v653_v32 = vmul.f32 %v1826_v46, %v1826_v46  ;;  %v2865_v50 = vld [vmem:[#allocation113_spill] sm:$0xff] }
  0xbb   :  { %v606_v10 = vadd.f32 %v605_v3, %v542_v17  ;;  %v713_v44 = vmul.f32 %v2862_v49, %v2862_v49  ;;  %v833_v63 = vmul.f32 %v2863_v55, %v2863_v55  ;;  %v773_v60 = vmul.f32 %v2864_v14, %v2864_v14  ;;  %v2871_v3 = vld [vmem:[#allocation118_spill] sm:$0xff] }
  0xbc   :  { %v666_v37 = vadd.f32 %v665_v38, %v651_v48  ;;  %v726_v52 = vadd.f32 %v725_v8, %v711_v27  ;;  %v786_v43 = vadd.f32 %v785_v53, %v771_v25  ;;  %v654_v47 = vmul.f32 %v1865_v62, %v1865_v62  ;;  %v2869_v62 = vld [vmem:[#allocation106_spill] sm:$0xff] }
  0xbd   :  { %v714_v17 = vmul.f32 %v2865_v50, %v2865_v50  ;;  %v834_v46 = vmul.f32 %v2866_v9, %v2866_v9  ;;  %v847_v54 = vadd.f32 %v832_v12, %v831_v26  ;;  %v774_v22 = vmul.f32 %v2867_v4, %v2867_v4  ;;  %v2870_v25 = vld [vmem:[#allocation114_spill] sm:$0xff]  ;;  %v2873_v26 = vld [vmem:[#allocation108_spill] sm:$0xff]  ;;  %v2878_v50 = vld [vmem:[#allocation127_spill] sm:$0xff] }
  0xbe   :  { %v667_v11 = vadd.f32 %v666_v37, %v652_v1  ;;  %v727_v6 = vadd.f32 %v726_v52, %v712_v20  ;;  %v787_v36 = vadd.f32 %v786_v43, %v772_v23  ;;  %v715_v48 = vmul.f32 %v1828_v19, %v1828_v19  ;;  %v2872_v20 = vld [vmem:[#allocation111_spill] sm:$0xff] }
  0xbf   :  { %v716_v39 = vmul.f32 %v2868_v34, %v2868_v34  ;;  %v835_v27 = vmul.f32 %v2869_v62, %v2869_v62  ;;  %v848_v31 = vadd.f32 %v847_v54, %v833_v63  ;;  %v775_v1 = vmul.f32 %v2870_v25, %v2870_v25 }
  0xc0   :  { %v668_v24 = vadd.f32 %v667_v11, %v653_v32  ;;  %v728_v57 = vadd.f32 %v727_v6, %v713_v44  ;;  %v788_v59 = vadd.f32 %v787_v36, %v773_v60  ;;  %v776_v41 = vmul.f32 %v2871_v3, %v2871_v3  ;;  %v2875_v32 = vld [vmem:[#allocation120_spill] sm:$0xff]  ;;  %v2880_v6 = vld [vmem:[#allocation115_spill] sm:$0xff]  ;;  %v2885_v3 = vld [vmem:[#allocation122_spill] sm:$0xff] }
  0xc1   :  { %v836_v35 = vmul.f32 %v2872_v20, %v2872_v20  ;;  %v849_v19 = vadd.f32 %v848_v31, %v834_v46  ;;  %v895_v0 = vmul.f32 %v2873_v26, %v2873_v26  ;;  %v896_v23 = vmul.f32 %v2874_v51, %v2874_v51  ;;  %v2876_v44 = vld [vmem:[#allocation116_spill] sm:$0xff]  ;;  %v2882_v31 = vld [vmem:[#allocation119_spill] sm:$0xff] }
  0xc2   :  { %v669_v12 = vadd.f32 %v668_v24, %v654_v47  ;;  %v729_v38 = vadd.f32 %v728_v57, %v714_v17  ;;  %v789_v8 = vadd.f32 %v788_v59, %v774_v22  ;;  %v717_v53 = vmul.f32 %v1884_v61, %v1884_v61  ;;  %v2877_v60 = vld [vmem:[#allocation112_spill] sm:$0xff]  ;;  %v2879_v61 = vld [vmem:[#allocation121_spill] sm:$0xff]  ;;  %v2883_v57 = vld [vmem:[#allocation130_spill] sm:$0xff] }
  0xc3   :  { %v777_v49 = vmul.f32 %v2875_v32, %v2875_v32  ;;  %v837_v55 = vmul.f32 %v2876_v44, %v2876_v44  ;;  %v850_v63 = vadd.f32 %v849_v19, %v835_v27  ;;  %v897_v43 = vmul.f32 %v2877_v60, %v2877_v60  ;;  %v2884_v59 = vld [vmem:[#allocation123_spill] sm:$0xff]  ;;  %v2886_v19 = vld [vmem:[#allocation124_spill] sm:$0xff]  ;;  %v2889_v44 = vld [vmem:[#allocation125_spill] sm:$0xff] }
  0xc4   :  { %v670_v37 = vadd.f32 %v669_v12, %v606_v10  ;;  %v730_v52 = vadd.f32 %v729_v38, %v715_v48  ;;  %v790_v14 = vadd.f32 %v789_v8, %v775_v1  ;;  %v718_v47 = vmul.f32 %v1932_v13, %v1932_v13  ;;  %v2881_v13 = vld [vmem:[#allocation126_spill] sm:$0xff]  ;;  %v2887_v12 = vld [vmem:[#allocation131_spill] sm:$0xff]  ;;  %v2888_v51 = vld [vmem:[#allocation128_spill] sm:$0xff] }
  0xc5   :  { %v778_v17 = vmul.f32 %v2878_v50, %v2878_v50  ;;  %v838_v9 = vmul.f32 %v2879_v61, %v2879_v61  ;;  %v851_v46 = vadd.f32 %v850_v63, %v836_v35  ;;  %v898_v10 = vmul.f32 %v2880_v6, %v2880_v6  ;;  %v2892_v61 = vld [vmem:[#allocation139_spill] sm:$0xff] }
  0xc6   :  { %v731_v54 = vadd.f32 %v730_v52, %v716_v39  ;;  %v791_v11 = vadd.f32 %v790_v14, %v776_v41  ;;  %v911_v4 = vadd.f32 %v896_v23, %v895_v0  ;;  %v779_v22 = vmul.f32 %v1887_v42, %v1887_v42  ;;  %v2890_v14 = vld [vmem:[#allocation132_spill] sm:$0xff] }
  0xc7   :  { %v780_v36 = vmul.f32 %v1915_v29, %v1915_v29  ;;  %v839_v48 = vmul.f32 %v2881_v13, %v2881_v13  ;;  %v852_v34 = vadd.f32 %v851_v46, %v837_v55  ;;  %v899_v39 = vmul.f32 %v2882_v31, %v2882_v31 }
  0xc8   :  { %v732_v62 = vadd.f32 %v731_v54, %v717_v53  ;;  %v792_v27 = vadd.f32 %v791_v11, %v777_v49  ;;  %v912_v24 = vadd.f32 %v911_v4, %v897_v43  ;;  %v840_v25 = vmul.f32 %v2883_v57, %v2883_v57  ;;  %v2894_v54 = vld [vmem:[#allocation133_spill] sm:$0xff] }
  0xc9   :  { %v853_v1 = vadd.f32 %v852_v34, %v838_v9  ;;  %v900_v42 = vmul.f32 %v2884_v59, %v2884_v59  ;;  %v959_v29 = vmul.f32 %v2885_v3, %v2885_v3  ;;  %v960_v26 = vmul.f32 %v2886_v19, %v2886_v19  ;;  %v2893_v9 = vld [vmem:[#allocation137_spill] sm:$0xff] }
  0xca   :  { %v733_v41 = vadd.f32 %v732_v62, %v718_v47  ;;  %v793_v20 = vadd.f32 %v792_v27, %v778_v17  ;;  %v913_v35 = vadd.f32 %v912_v24, %v898_v10  ;;  %v781_v0 = vmul.f32 %v1942_v56, %v1942_v56  ;;  %v2891_v47 = vld [vmem:[#allocation129_spill] sm:$0xff] }
  0xcb   :  { %v841_v38 = vmul.f32 %v2887_v12, %v2887_v12  ;;  %v854_v8 = vadd.f32 %v853_v1, %v839_v48  ;;  %v901_v23 = vmul.f32 %v2888_v51, %v2888_v51  ;;  %v961_v55 = vmul.f32 %v2889_v44, %v2889_v44  ;;  %v2896_v48 = vld [vmem:[#allocation134_spill] sm:$0xff]  ;;  %v2899_v59 = vld [vmem:[#allocation141_spill] sm:$0xff] }
  0xcc   :  { %v734_v53 = vadd.f32 %v733_v41, %v670_v37  ;;  %v794_v32 = vadd.f32 %v793_v20, %v779_v22  ;;  %v914_v49 = vadd.f32 %v913_v35, %v899_v39  ;;  %v782_v63 = vmul.f32 %v1975_v28, %v1975_v28  ;;  %v2897_v39 = vld [vmem:[#allocation135_spill] sm:$0xff]  ;;  %v2904_v44 = vld [vmem:[#allocation142_spill] sm:$0xff] }
  0xcd   :  { %v855_v52 = vadd.f32 %v854_v8, %v840_v25  ;;  %v902_v56 = vmul.f32 %v2890_v14, %v2890_v14  ;;  %v962_v50 = vmul.f32 %v2891_v47, %v2891_v47  ;;  %v975_v17 = vadd.f32 %v960_v26, %v959_v29  ;;  %v2898_v25 = vld [vmem:[#allocation143_spill] sm:$0xff]  ;;  %v2901_v26 = vld [vmem:[#allocation144_spill] sm:$0xff] }
  0xce   :  { %v795_v60 = vadd.f32 %v794_v32, %v780_v36  ;;  %v915_v43 = vadd.f32 %v914_v49, %v900_v42  ;;  %v842_v37 = vmul.f32 %v2892_v61, %v2892_v61  ;;  %v903_v46 = vmul.f32 %v2893_v9, %v2893_v9  ;;  %v2895_v36 = vld [vmem:[#allocation138_spill] sm:$0xff]  ;;  %v2900_v42 = vld [vmem:[#allocation136_spill] sm:$0xff] }
  0xcf   :  { %v963_v11 = vmul.f32 %v2894_v54, %v2894_v54  ;;  %v856_v6 = vadd.f32 %v855_v52, %v841_v38  ;;  %v976_v4 = vadd.f32 %v975_v17, %v961_v55  ;;  %v904_v22 = vmul.f32 %v1935_v16, %v1935_v16  ;;  %v2902_v38 = vld [vmem:[#allocation140_spill] sm:$0xff] }
  0xd0   :  { %v796_v28 = vadd.f32 %v795_v60, %v781_v0  ;;  %v916_v10 = vadd.f32 %v915_v43, %v901_v23  ;;  %v964_v13 = vmul.f32 %v2895_v36, %v2895_v36  ;;  %v1023_v34 = vmul.f32 %v2896_v48, %v2896_v48  ;;  %v2903_v23 = vld [vmem:[#allocation145_spill] sm:$0xff]  ;;  %v2909_v36 = vld [vmem:[#allocation150_spill] sm:$0xff] }
  0xd1   :  { %v977_v31 = vadd.f32 %v976_v4, %v962_v50  ;;  %v1024_v24 = vmul.f32 %v2897_v39, %v2897_v39  ;;  %v843_v57 = vmul.f32 %v1945_v2, %v1945_v2  ;;  %v905_v1 = vmul.f32 %v2898_v25, %v2898_v25  ;;  %v2906_v50 = vld [vmem:[#allocation146_spill] sm:$0xff] }
  0xd2   :  { %v797_v62 = vadd.f32 %v796_v28, %v782_v63  ;;  %v917_v27 = vadd.f32 %v916_v10, %v902_v56  ;;  %v965_v16 = vmul.f32 %v2899_v59, %v2899_v59  ;;  %v1025_v3 = vmul.f32 %v2900_v42, %v2900_v42  ;;  %v2905_v56 = vld [vmem:[#allocation149_spill] sm:$0xff]  ;;  %v2913_v42 = vld [vmem:[#allocation12_spill] sm:$0xff] }
  0xd3   :  { %v857_v41 = vadd.f32 %v856_v6, %v842_v37  ;;  %v978_v35 = vadd.f32 %v977_v31, %v963_v11  ;;  %v906_v19 = vmul.f32 %v1970_v18, %v1970_v18  ;;  %v966_v0 = vmul.f32 %v2901_v26, %v2901_v26 }
  0xd4   :  { %v798_v29 = vadd.f32 %v797_v62, %v734_v53  ;;  %v918_v20 = vadd.f32 %v917_v27, %v903_v46  ;;  %v1026_v8 = vmul.f32 %v2902_v38, %v2902_v38  ;;  %v1039_v51 = vadd.f32 %v1024_v24, %v1023_v34  ;;  %v2908_v46 = vld [vmem:[#allocation148_spill] sm:$0xff]  ;;  %v2910_v62 = vld [vmem:[#allocation151_spill] sm:$0xff] }
  0xd5   :  { %v979_v12 = vadd.f32 %v978_v35, %v964_v13  ;;  %v844_v32 = vmul.f32 %v2903_v23, %v2903_v23  ;;  %v907_v53 = vmul.f32 %v1988_v58, %v1988_v58  ;;  %v967_v49 = vmul.f32 %v1972_v30, %v1972_v30  ;;  %v2907_v58 = vld [vmem:[#allocation147_spill] sm:$0xff]  ;;  %v2916_v38 = vld [vmem:[#allocation156_spill] sm:$0xff] }
  0xd6   :  { %v919_v2 = vadd.f32 %v918_v20, %v904_v22  ;;  %v1027_v18 = vmul.f32 %v2904_v44, %v2904_v44  ;;  %v858_v55 = vadd.f32 %v857_v41, %v843_v57  ;;  %v1040_v14 = vadd.f32 %v1039_v51, %v1025_v3  ;;  %v2914_v3 = vld [vmem:[#allocation154_spill] sm:$0xff]  ;;  %v2917_v51 = vld [vmem:[#allocation155_spill] sm:$0xff] }
  0xd7   :  { %v980_v52 = vadd.f32 %v979_v12, %v965_v16  ;;  %v968_v60 = vmul.f32 %v2905_v56, %v2905_v56  ;;  %v1028_v17 = vmul.f32 %v2906_v50, %v2906_v50  ;;  %v845_v37 = vmul.f32 %v2907_v58, %v2907_v58  ;;  %v2912_v16 = vld [vmem:[#allocation153_spill] sm:$0xff] }
  0xd8   :  { %v920_v63 = vadd.f32 %v919_v2, %v905_v1  ;;  %v1041_v61 = vadd.f32 %v1040_v14, %v1026_v8  ;;  %v908_v30 = vmul.f32 %v2003_v15, %v2003_v15  ;;  %v969_v9 = vmul.f32 %v2005_v5, %v2005_v5  ;;  %v2911_v1 = vld [vmem:[#allocation152_spill] sm:$0xff]  ;;  %v2919_v56 = vld [vmem:[#allocation13_spill] sm:$0xff] }
  0xd9   :  { %v981_v47 = vadd.f32 %v980_v52, %v966_v0  ;;  %v1029_v54 = vmul.f32 %v2908_v46, %v2908_v46  ;;  %v859_v11 = vadd.f32 %v858_v55, %v844_v32  ;;  %v970_v4 = vmul.f32 %v2018_v33, %v2018_v33 }
  0xda   :  { %v921_v43 = vadd.f32 %v920_v63, %v906_v19  ;;  %v1042_v10 = vadd.f32 %v1041_v61, %v1027_v18  ;;  %v1030_v13 = vmul.f32 %v2909_v36, %v2909_v36  ;;  %v846_v15 = vmul.f32 %v2008_v7, %v2008_v7  ;;  %v2918_v18 = vld [vmem:[#allocation11_spill] sm:$0xff] }
  0xdb   :  { %v982_v6 = vadd.f32 %v981_v47, %v967_v49  ;;  %v909_v5 = vmul.f32 %v2016_v21, %v2016_v21  ;;  %v971_v34 = vmul.f32 %v2032_v40, %v2032_v40  ;;  %v1031_v27 = vmul.f32 %v2910_v62, %v2910_v62  ;;  %v2920_v47 = vld [vmem:[#allocation16_spill] sm:$0xff] }
  0xdc   :  { %v922_v28 = vadd.f32 %v921_v43, %v907_v53  ;;  %v1043_v48 = vadd.f32 %v1042_v10, %v1028_v17  ;;  %v860_v31 = vadd.f32 %v859_v11, %v845_v37  ;;  %v972_v57 = vmul.f32 %v2043_v45, %v2043_v45  ;;  %v2915_v45 = vld [vmem:[#allocation10_spill] sm:$0xff] }
  0xdd   :  { %v983_v22 = vadd.f32 %v982_v6, %v968_v60  ;;  %v1032_v7 = vmul.f32 %v2911_v1, %v2911_v1  ;;  %v910_v21 = vmul.f32 %v2912_v16, %v2912_v16  ;;  %v973_v40 = vmul.f32 %v2913_v42, %v2913_v42 }
  0xde   :  { %v923_v39 = vadd.f32 %v922_v28, %v908_v30  ;;  %v1044_v24 = vadd.f32 %v1043_v48, %v1029_v54  ;;  %v1033_v41 = vmul.f32 %v2914_v3, %v2914_v3  ;;  %v861_v20 = vadd.f32 %v860_v31, %v846_v15 }
  0xdf   :  { %v984_v33 = vadd.f32 %v983_v22, %v969_v9  ;;  %v1034_v2 = vmul.f32 %v2915_v45, %v2915_v45  ;;  %v974_v8 = vmul.f32 %v2916_v38, %v2916_v38  ;;  %v1035_v23 = vmul.f32 %v2917_v51, %v2917_v51 }
  0xe0   :  { %v1045_v59 = vadd.f32 %v1044_v24, %v1030_v13  ;;  %v924_v35 = vadd.f32 %v923_v39, %v909_v5  ;;  %v862_v32 = vadd.f32 %v861_v20, %v798_v29  ;;  %v1036_v55 = vmul.f32 %v2918_v18, %v2918_v18 }
  0xe1   :  { %v985_v25 = vadd.f32 %v984_v33, %v970_v4  ;;  %v1037_v60 = vmul.f32 %v2919_v56, %v2919_v56  ;;  %v1038_v50 = vmul.f32 %v2920_v47, %v2920_v47 }
  0xe2   :  { %v1046_v26 = vadd.f32 %v1045_v59, %v1031_v27  ;;  %v925_v53 = vadd.f32 %v924_v35, %v910_v21 }
  0xe3   :  { %v986_v19 = vadd.f32 %v985_v25, %v971_v34 }
  0xe4   :  { %v1047_v12 = vadd.f32 %v1046_v26, %v1032_v7  ;;  %v926_v52 = vadd.f32 %v925_v53, %v862_v32 }
  0xe5   :  { %v987_v0 = vadd.f32 %v986_v19, %v972_v57 }
  0xe6   :  { %v1048_v44 = vadd.f32 %v1047_v12, %v1033_v41 }
  0xe7   :  { %v988_v49 = vadd.f32 %v987_v0, %v973_v40 }
  0xe8   :  { %v1049_v63 = vadd.f32 %v1048_v44, %v1034_v2 }
  0xe9   :  { %v989_v14 = vadd.f32 %v988_v49, %v974_v8 }
  0xea   :  { %v1050_v43 = vadd.f32 %v1049_v63, %v1035_v23 }
  0xeb   :  { %v990_v61 = vadd.f32 %v989_v14, %v926_v52 }
  0xec   :  { %v1051_v17 = vadd.f32 %v1050_v43, %v1036_v55 }
  0xee   :  { %v1052_v58 = vadd.f32 %v1051_v17, %v1037_v60 }
  0xf0   :  { %v1053_v29 = vadd.f32 %v1052_v58, %v1038_v50 }
  0xf2   :  { %v1054_v37 = vadd.f32 %v1053_v29, %v990_v61 }
  0xf4   :  { %1071 = vadd.xlane.f32.xlu0 %v1054_v37 }
 0x11f   :  { %v1062_v30 = vpop.xlane.xlu0 %1061 }
 0x120   :  { %v1063_v9 = vrot.slane %v1062_v30, 4 }
 0x122   :  { %v1064_v46 = vadd.f32 %v1063_v9, %v1062_v30 }
 0x124   :  { %v1065_v54 = vrot.slane %v1064_v46, 2 }
 0x126   :  { %v1066_v11 = vadd.f32 %v1065_v54, %v1064_v46 }
 0x128   :  { %v1067_v28 = vrot.slane %v1066_v11, 1 }
 0x12a   :  { %v1068_v6 = vadd.f32 %v1067_v28, %v1066_v11 }
 0x12c   :  { %1117 = vpush %v1068_v6 }
 0x15d   :  { %s1118_s0 = spop %1117 }
 0x15e   :  { %s1082_s20 = smul.f32 3.8146973e-06, %s1118_s0 }
 0x160   :  { %s1083_s21 = smul.f32 262144.0, %s1082_s20 }
 0x162   :  { %s1084_s22 = smul.f32 %s1083_s21, %s1082_s20 }
 0x181   :  { %v1072_v10 = vpop.xlane.xlu0 %1071 }
 0x182   :  { %v1073_v4 = vrot.slane %v1072_v10, 4 }
 0x184   :  { %v1074_v22 = vadd.f32 %v1073_v4, %v1072_v10 }
 0x186   :  { %v1075_v36 = vrot.slane %v1074_v22, 2 }
 0x188   :  { %v1076_v13 = vadd.f32 %v1075_v36, %v1074_v22 }
 0x18a   :  { %v1077_v48 = vrot.slane %v1076_v13, 1 }
 0x18c   :  { %v1078_v15 = vadd.f32 %v1077_v48, %v1076_v13 }
 0x18e   :  { %1119 = vpush %v1078_v15 }
 0x1bf   :  { %s1120_s23 = spop %1119 }
 0x1c0   :  { %s1085_s24 = ssub.f32 %s1120_s23, %s1084_s22 }
 0x1c2   :  { %s1088_s25 = smul.f32 3.814712e-06, %s1085_s24 }
 0x1c4   :  { %s1089_s27 = smax.f32 %s1181_s26, %s1088_s25 }
 0x1c5   :  { %v1090_v5 = vstv %s1089_s27 }
 0x1c6   :  { %1128 = vrsqrt.f32 %v1090_v5  ;;  %vm1093_vm0 = vcmp.eq.f32.partialorder %v1090_v5, inf  ;;  %v1096_v27 = vand.u32 2147483648, %v1090_v5  ;;  %vm1095_vm1 = vcmp.eq.f32.partialorder %v1090_v5, 0.0 }
 0x1d0   :  { %v1129_v34 = vpop.eup %1128 }
 0x1d1   :  { %v1092_v62 = vmul.f32 %v1129_v34, %v1090_v5 }
 0x1d3   :  { %v1094_v31 = vsel %vm1093_vm0, %v1090_v5, %v1092_v62 }
 0x1d4   :  { %v1097_v39 = vsel %vm1095_vm1, %v1096_v27, %v1094_v31 }
 0x1d5   :  { %1121 = vpush %v1097_v39 }
 0x206   :  { %s1122_s30 = spop %1121 }
 0x207   :  { %s1099_s2 = sadd.f32 %s1122_s30, %s1082_s20 }
 0x209   :  { %v1100_v33 = vstv %s1099_s2 }
 0x20a   :  { %1101 = vst [vmem:[#allocation7] sm:$0xff] %v1100_v33 }
 0x20b   :  { %1163 = shalt.err (!%p1160_p12)
}
 0x20c   :  { %s1164_s6 = scalar_lea.hbm %s2464_s1, 128 }
 0x20d   :  { %p1165_p13 = scmp.ne.s32.totalorder %s2464_s1, %s1164_s6  ;;  %p1168_p0 = scmp.lt.u32.totalorder %s1164_s6, %s2464_s1 }
 0x20f   :  { %p1170_p1 = pnand %p1168_p0, %p1165_p13 }
 0x211   :  { %1173 = shalt.err (!%p1170_p1)
}
 0x212   :  { %1111 = dma.vmem_to_hbm [thread:$0]  %s1109_s29, 128, %s2464_s1, [#allocation6]  }
 0x213   :  { %1176 = dma.done.wait [#allocation6], 128  }
 0x214   :  { %1177 = vsyncadd [#allocation6], 4294967168 }
 0x215   :  { %1115 = vsyncpa [#allocation5], 1 }
 0x216   :  { %1116 = vsyncpa [#allocation6], 1 }

</bundles_post_ra>
